<compile_context>
chip_gen: v7x
topology: tpu7x:2x2x1
jax: 0.10.0
libtpu: 0.0.40
codegen_flags: <defaults>
</compile_context>

<pallas_src>
import functools

import jax
import jax.numpy as jnp
from jax import lax
from jax.experimental import pallas as pl
from jax.experimental.pallas import tpu as pltpu


# --------------------------- helpers ---------------------------------------

def _round_up(x, m):
    return (x + m - 1) // m * m


def _pad2d(a, rows, cols):
    return jnp.pad(a, ((0, rows - a.shape[0]), (0, cols - a.shape[1])))


def _use_order_a(f_in, f_out):
    # True  -> (adj @ x) @ W   (adj matmul width = f_in)
    # False -> adj @ (x @ W)   (adj matmul width = f_out)
    return f_in <= f_out


# --------------------------- kernel -----------------------------------------

def _gcn_layer_kernel(adj_ref, x_ref, w_ref, b_ref, out_ref, acc_ref, *,
                      order_a, apply_relu, n_classes):
    """One graph-conv layer. Grid = (row blocks, column/reduction blocks)."""
    k = pl.program_id(1)

    @pl.when(k == 0)
    def _init():
        acc_ref[...] = jnp.zeros_like(acc_ref)

    if order_a:
        # acc[TM, F_in] += adj_tile @ x_tile         (bf16 x bf16 -> f32)
        acc_ref[...] += jnp.dot(adj_ref[...], x_ref[...],
                                preferred_element_type=jnp.float32)
    else:
        # support = x_tile @ W (bf16);  acc[TM, F_out] += adj_tile @ support
        support = jnp.dot(x_ref[...], w_ref[...].astype(jnp.bfloat16),
                          preferred_element_type=jnp.float32)
        acc_ref[...] += jnp.dot(adj_ref[...], support.astype(jnp.bfloat16),
                                preferred_element_type=jnp.float32)

    @pl.when(k == pl.num_programs(1) - 1)
    def _finalize():
        if order_a:
            y = jnp.dot(acc_ref[...], w_ref[...],
                        preferred_element_type=jnp.float32) + b_ref[...]
        else:
            y = acc_ref[...] + b_ref[...]
        if apply_relu:
            y = jnp.maximum(y, 0.0)
        if n_classes is not None:
            # Lane-dense padded output: mask padded class lanes so they do not
            # contribute to the row-wise max / sum of the log_softmax.
            col = lax.broadcasted_iota(jnp.int32, y.shape, 1)
            y = jnp.where(col < n_classes, y, -1e30)
            m = jnp.max(y, axis=1, keepdims=True)
            ys = y - m
            lse = jnp.log(jnp.sum(jnp.exp(ys), axis=1, keepdims=True))
            y = ys - lse
        out_ref[...] = y


def _gcn_layer_pallas(adj_bf, x_bf, w, b, *, apply_relu, log_softmax_classes,
                      tm, tk):
    n_pad = adj_bf.shape[0]
    f_in = x_bf.shape[1]
    f_out = w.shape[1]
    order_a = _use_order_a(f_in, f_out)
    acc_width = f_in if order_a else f_out

    kernel = functools.partial(
        _gcn_layer_kernel, order_a=order_a, apply_relu=apply_relu,
        n_classes=log_softmax_classes)

    grid = (n_pad // tm, n_pad // tk)

    # Advisory cost hint: the kernel is HBM-bound on adj at real graph sizes.
    flops = 2 * n_pad * n_pad * acc_width + 2 * n_pad * f_in * f_out
    transcendentals = n_pad * f_out if log_softmax_classes is not None else 0
    bytes_accessed = (adj_bf.size * adj_bf.dtype.itemsize
                      + x_bf.size * x_bf.dtype.itemsize
                      + w.size * 4 + b.size * 4 + n_pad * f_out * 4)

    return pl.pallas_call(
        kernel,
        out_shape=jax.ShapeDtypeStruct((n_pad, f_out), jnp.float32),
        grid_spec=pltpu.PrefetchScalarGridSpec(
            num_scalar_prefetch=0,
            grid=grid,
            in_specs=[
                pl.BlockSpec((tm, tk), lambda i, k: (i, k)),             # adj tile
                pl.BlockSpec((tk, f_in), lambda i, k: (k, 0)),           # x row-tile
                pl.BlockSpec((w.shape[0], f_out), lambda i, k: (0, 0)),  # W (full)
                pl.BlockSpec((1, f_out), lambda i, k: (0, 0)),           # bias row
            ],
            out_specs=pl.BlockSpec((tm, f_out), lambda i, k: (i, 0)),
            scratch_shapes=[pltpu.VMEM((tm, acc_width), jnp.float32)],
        ),
        compiler_params=pltpu.CompilerParams(
            dimension_semantics=("parallel", "arbitrary")),
        cost_estimate=pl.CostEstimate(
            flops=flops, transcendentals=transcendentals,
            bytes_accessed=bytes_accessed),
    )(adj_bf, x_bf, w, b)


# ------------------ matched-precision pure-JAX reference --------------------

def _gcn_layer_ref(adj_bf, x_bf, w, b, *, apply_relu, log_softmax_classes,
                   tm=None, tk=None):
    del tm, tk
    order_a = _use_order_a(x_bf.shape[1], w.shape[1])
    if order_a:
        y = jnp.dot(adj_bf, x_bf, preferred_element_type=jnp.float32)
        y = jnp.dot(y, w, preferred_element_type=jnp.float32) + b
    else:
        s = jnp.dot(x_bf, w.astype(jnp.bfloat16),
                    preferred_element_type=jnp.float32)
        y = jnp.dot(adj_bf, s.astype(jnp.bfloat16),
                    preferred_element_type=jnp.float32) + b
    if apply_relu:
        y = jnp.maximum(y, 0.0)
    if log_softmax_classes is not None:
        col = lax.broadcasted_iota(jnp.int32, y.shape, 1)
        y = jnp.where(col < log_softmax_classes, y, -1e30)
        m = jnp.max(y, axis=1, keepdims=True)
        ys = y - m
        y = ys - jnp.log(jnp.sum(jnp.exp(ys), axis=1, keepdims=True))
    return y


# --------------------------- forward driver ---------------------------------

def _gcn_forward(x, adj, w1, b1, w2, b2, layer_fn, *, tm=128, tk=128):
    n, f_in = x.shape
    hidden = w1.shape[1]
    n_classes = w2.shape[1]

    n_pad = _round_up(n, max(tm, tk))
    h_pad = _round_up(hidden, 128)      # lane-dense hidden activations
    c_pad = _round_up(n_classes, 128)   # lane-dense (unmasked vst) output

    # bf16 operands for the big adj matmuls; weights/bias/epilogue stay f32.
    adj_bf = _pad2d(adj, n_pad, n_pad).astype(jnp.bfloat16)
    x_bf = _pad2d(x, n_pad, f_in).astype(jnp.bfloat16)
    w1_p = _pad2d(w1, f_in, h_pad).astype(jnp.float32)
    b1_p = _pad2d(b1.reshape(1, -1), 1, h_pad).astype(jnp.float32)
    w2_p = _pad2d(w2, h_pad, c_pad).astype(jnp.float32)
    b2_p = _pad2d(b2.reshape(1, -1), 1, c_pad).astype(jnp.float32)

    h = layer_fn(adj_bf, x_bf, w1_p, b1_p, apply_relu=True,
                 log_softmax_classes=None, tm=tm, tk=tk)
    # TODO(synk): F.dropout with training=True (random mask) not implemented;
    # inference-mode dropout is the identity (would need pltpu.prng_seed +
    # pltpu.prng_random_bits after the ReLU).
    out = layer_fn(adj_bf, h.astype(jnp.bfloat16), w2_p, b2_p,
                   apply_relu=False, log_softmax_classes=n_classes,
                   tm=tm, tk=tk)
    return out[:n, :n_classes]


@functools.partial(jax.jit, static_argnames=("tm", "tk"))
def gcn_forward(x, adj, w1, b1, w2, b2, tm=128, tk=128):
    return _gcn_forward(x, adj, w1, b1, w2, b2, _gcn_layer_pallas, tm=tm, tk=tk)


def reference_forward(x, adj, w1, b1, w2, b2):
    return _gcn_forward(x, adj, w1, b1, w2, b2, _gcn_layer_ref)


# ------------------------------- test ----------------------------------------

if __name__ == "__main__":
    # Small deterministic problem consistent with the module's shapes.
    # (N not a multiple of 128 and F_in > hidden to exercise padding and both
    #  matmul orderings.)
    N, IN_FEAT, HIDDEN, OUT_FEAT = 200, 160, 48, 8

    key = jax.random.PRNGKey(0)
    kx, kadj, kw1, kw2, kb1, kb2 = jax.random.split(key, 6)

    x = jax.random.normal(kx, (N, IN_FEAT), dtype=jnp.float32)

    # Dense row-normalized adjacency (stands in for the sparse A).
    a_raw = (jax.random.uniform(kadj, (N, N)) < 0.05).astype(jnp.float32)
    a_raw = a_raw + jnp.eye(N, dtype=jnp.float32)
    adj = a_raw / jnp.sum(a_raw, axis=1, keepdims=True)

    # init_params: weights ~ uniform_(0,1); biases init to zero in the module
    # but become nonzero after training -> use small random biases here so the
    # bias path is actually exercised.
    w1 = jax.random.uniform(kw1, (IN_FEAT, HIDDEN), dtype=jnp.float32)
    b1 = 0.1 * jax.random.normal(kb1, (HIDDEN,), dtype=jnp.float32)
    w2 = jax.random.uniform(kw2, (HIDDEN, OUT_FEAT), dtype=jnp.float32)
    b2 = 0.1 * jax.random.normal(kb2, (OUT_FEAT,), dtype=jnp.float32)

    out = jax.block_until_ready(gcn_forward(x, adj, w1, b1, w2, b2))
    ref = jax.block_until_ready(reference_forward(x, adj, w1, b1, w2, b2))

    assert out.shape == (N, OUT_FEAT)
    # log_softmax rows must normalize.
    assert jnp.allclose(jnp.sum(jnp.exp(out), axis=1), 1.0, atol=1e-3), \
        "rows not normalized"
    # bf16 matmul operands (f32 accumulation) -> modest tolerance vs the
    # matched-precision reference (tiled vs untiled reductions, bf16 rounding).
    assert jnp.allclose(out, ref, atol=1.5e-1, rtol=2e-2), "mismatch vs reference"

    print("KERNEL_OK")
</pallas_src>

<mosaic_0001>
module attributes {stable_mosaic.version = 11 : i64} {
  func.func @_gcn_layer_kernel(%arg0: i32, %arg1: i32, %arg2: memref<128x128xbf16, #tpu.memory_space<vmem>>, %arg3: memref<128x160xbf16, #tpu.memory_space<vmem>>, %arg4: memref<160x128xf32, #tpu.memory_space<vmem>>, %arg5: memref<1x128xf32, #tpu.memory_space<vmem>>, %arg6: memref<128x128xf32, #tpu.memory_space<vmem>>, %arg7: memref<128x128xf32, #tpu.memory_space<vmem>>) attributes {dimension_semantics = [#tpu.dimension_semantics<parallel>, #tpu.dimension_semantics<arbitrary>], iteration_bounds = array<i64: 2, 2>, scalar_prefetch = 0 : i64, scratch_operands = 1 : i64, tpu.core_type = #tpu.core_type<tc>, window_params = [{transform_indices = @transform_0, window_bounds = array<i64: 128, 128>}, {transform_indices = @transform_1, window_bounds = array<i64: 128, 160>}, {pipeline_mode = #tpu.pipeline_mode<synchronous>, transform_indices = @transform_2, window_bounds = array<i64: 160, 128>}, {pipeline_mode = #tpu.pipeline_mode<synchronous>, transform_indices = @transform_3, window_bounds = array<i64: 1, 128>}, {transform_indices = @transform_4, window_bounds = array<i64: 128, 128>}]} {
    %c0_i32 = arith.constant 0 : i32
    %0 = arith.cmpi eq, %arg1, %c0_i32 : i32
    %1 = arith.extui %0 : i1 to i32
    %c0_i32_0 = arith.constant 0 : i32
    %2 = arith.cmpi ne, %1, %c0_i32_0 : i32
    scf.if %2 {
      %cst_12 = arith.constant 0.000000e+00 : f32
      %16 = vector.broadcast %cst_12 : f32 to vector<128x128xf32>
      %c0_13 = arith.constant 0 : index
      %c0_14 = arith.constant 0 : index
      %17 = vector.load %arg7[%c0_13, %c0_14] : memref<128x128xf32, #tpu.memory_space<vmem>>, vector<128x128xf32>
      tpu.vector_store %arg7[%c0_13, %c0_14], %16 {strides = array<i32>} : memref<128x128xf32, #tpu.memory_space<vmem>>, vector<128x128xf32>,
    } else {
    }
    %c0 = arith.constant 0 : index
    %c0_1 = arith.constant 0 : index
    %3 = vector.load %arg3[%c0, %c0_1] : memref<128x160xbf16, #tpu.memory_space<vmem>>, vector<128x160xbf16>
    %c0_2 = arith.constant 0 : index
    %c0_3 = arith.constant 0 : index
    %4 = vector.load %arg4[%c0_2, %c0_3] : memref<160x128xf32, #tpu.memory_space<vmem>>, vector<160x128xf32>
    %5 = arith.truncf %4 : vector<160x128xf32> to vector<160x128xbf16>
    %cst = arith.constant dense<0.000000e+00> : vector<128x128xf32>
    %6 = tpu.matmul %3, %5, %cst {dimension_numbers = #tpu.dot_dimension_numbers<[1], [0], [0], [1], [0, 0, 1, 1], [], []>} : vector<128x160xbf16>, vector<160x128xbf16>, vector<128x128xf32> -> vector<128x128xf32>
    %c0_4 = arith.constant 0 : index
    %c0_5 = arith.constant 0 : index
    %7 = vector.load %arg7[%c0_4, %c0_5] : memref<128x128xf32, #tpu.memory_space<vmem>>, vector<128x128xf32>
    %c0_6 = arith.constant 0 : index
    %c0_7 = arith.constant 0 : index
    %8 = vector.load %arg2[%c0_6, %c0_7] : memref<128x128xbf16, #tpu.memory_space<vmem>>, vector<128x128xbf16>
    %9 = arith.truncf %6 : vector<128x128xf32> to vector<128x128xbf16>
    %cst_8 = arith.constant dense<0.000000e+00> : vector<128x128xf32>
    %10 = tpu.matmul %8, %9, %cst_8 {dimension_numbers = #tpu.dot_dimension_numbers<[1], [0], [0], [1], [0, 0, 1, 1], [], []>} : vector<128x128xbf16>, vector<128x128xbf16>, vector<128x128xf32> -> vector<128x128xf32>
    %11 = arith.addf %7, %10 : vector<128x128xf32>
    %c0_9 = arith.constant 0 : index
    %c0_10 = arith.constant 0 : index
    %12 = vector.load %arg7[%c0_9, %c0_10] : memref<128x128xf32, #tpu.memory_space<vmem>>, vector<128x128xf32>
    tpu.vector_store %arg7[%c0_9, %c0_10], %11 {strides = array<i32>} : memref<128x128xf32, #tpu.memory_space<vmem>>, vector<128x128xf32>,
    %c1_i32 = arith.constant 1 : i32
    %13 = arith.cmpi eq, %arg1, %c1_i32 : i32
    %14 = arith.extui %13 : i1 to i32
    %c0_i32_11 = arith.constant 0 : i32
    %15 = arith.cmpi ne, %14, %c0_i32_11 : i32
    scf.if %15 {
      %c0_12 = arith.constant 0 : index
      %c0_13 = arith.constant 0 : index
      %16 = vector.load %arg7[%c0_12, %c0_13] : memref<128x128xf32, #tpu.memory_space<vmem>>, vector<128x128xf32>
      %c0_14 = arith.constant 0 : index
      %c0_15 = arith.constant 0 : index
      %17 = vector.load %arg5[%c0_14, %c0_15] : memref<1x128xf32, #tpu.memory_space<vmem>>, vector<1x128xf32>
      %18 = vector.broadcast %17 : vector<1x128xf32> to vector<128x128xf32>
      %19 = arith.addf %16, %18 : vector<128x128xf32>
      %cst_16 = arith.constant 0.000000e+00 : f32
      %20 = vector.broadcast %cst_16 : f32 to vector<128x128xf32>
      %21 = arith.maximumf %19, %20 : vector<128x128xf32>
      %c0_17 = arith.constant 0 : index
      %c0_18 = arith.constant 0 : index
      %22 = vector.load %arg6[%c0_17, %c0_18] : memref<128x128xf32, #tpu.memory_space<vmem>>, vector<128x128xf32>
      tpu.vector_store %arg6[%c0_17, %c0_18], %21 {strides = array<i32>} : memref<128x128xf32, #tpu.memory_space<vmem>>, vector<128x128xf32>,
    } else {
    }
    return
  }
  func.func @transform_0(%arg0: i32, %arg1: i32) -> (i32, i32) {
    %c0_i32 = arith.constant 0 : i32
    return %arg0, %arg1 : i32, i32
  }
  func.func @transform_1(%arg0: i32, %arg1: i32) -> (i32, i32) {
    %c0_i32 = arith.constant 0 : i32
    %c0_i32_0 = arith.constant 0 : i32
    return %arg1, %c0_i32 : i32, i32
  }
  func.func @transform_2(%arg0: i32, %arg1: i32) -> (i32, i32) {
    %c0_i32 = arith.constant 0 : i32
    %c0_i32_0 = arith.constant 0 : i32
    %c0_i32_1 = arith.constant 0 : i32
    return %c0_i32, %c0_i32_0 : i32, i32
  }
  func.func @transform_3(%arg0: i32, %arg1: i32) -> (i32, i32) {
    %c0_i32 = arith.constant 0 : i32
    %c0_i32_0 = arith.constant 0 : i32
    %c0_i32_1 = arith.constant 0 : i32
    return %c0_i32, %c0_i32_0 : i32, i32
  }
  func.func @transform_4(%arg0: i32, %arg1: i32) -> (i32, i32) {
    %c0_i32 = arith.constant 0 : i32
    %c0_i32_0 = arith.constant 0 : i32
    return %arg0, %c0_i32 : i32, i32
  }
}

module attributes {stable_mosaic.version = 11 : i64} {
  func.func @_gcn_layer_kernel(%arg0: i32, %arg1: i32, %arg2: memref<128x128xbf16, #tpu.memory_space<vmem>>, %arg3: memref<128x128xbf16, #tpu.memory_space<vmem>>, %arg4: memref<128x128xf32, #tpu.memory_space<vmem>>, %arg5: memref<1x128xf32, #tpu.memory_space<vmem>>, %arg6: memref<128x128xf32, #tpu.memory_space<vmem>>, %arg7: memref<128x128xf32, #tpu.memory_space<vmem>>) attributes {dimension_semantics = [#tpu.dimension_semantics<parallel>, #tpu.dimension_semantics<arbitrary>], iteration_bounds = array<i64: 2, 2>, scalar_prefetch = 0 : i64, scratch_operands = 1 : i64, tpu.core_type = #tpu.core_type<tc>, window_params = [{transform_indices = @transform_0, window_bounds = array<i64: 128, 128>}, {transform_indices = @transform_1, window_bounds = array<i64: 128, 128>}, {pipeline_mode = #tpu.pipeline_mode<synchronous>, transform_indices = @transform_2, window_bounds = array<i64: 128, 128>}, {pipeline_mode = #tpu.pipeline_mode<synchronous>, transform_indices = @transform_3, window_bounds = array<i64: 1, 128>}, {transform_indices = @transform_4, window_bounds = array<i64: 128, 128>}]} {
    %c0_i32 = arith.constant 0 : i32
    %0 = arith.cmpi eq, %arg1, %c0_i32 : i32
    %1 = arith.extui %0 : i1 to i32
    %c0_i32_0 = arith.constant 0 : i32
    %2 = arith.cmpi ne, %1, %c0_i32_0 : i32
    scf.if %2 {
      %cst_9 = arith.constant 0.000000e+00 : f32
      %12 = vector.broadcast %cst_9 : f32 to vector<128x128xf32>
      %c0_10 = arith.constant 0 : index
      %c0_11 = arith.constant 0 : index
      %13 = vector.load %arg7[%c0_10, %c0_11] : memref<128x128xf32, #tpu.memory_space<vmem>>, vector<128x128xf32>
      tpu.vector_store %arg7[%c0_10, %c0_11], %12 {strides = array<i32>} : memref<128x128xf32, #tpu.memory_space<vmem>>, vector<128x128xf32>,
    } else {
    }
    %c0 = arith.constant 0 : index
    %c0_1 = arith.constant 0 : index
    %3 = vector.load %arg7[%c0, %c0_1] : memref<128x128xf32, #tpu.memory_space<vmem>>, vector<128x128xf32>
    %c0_2 = arith.constant 0 : index
    %c0_3 = arith.constant 0 : index
    %4 = vector.load %arg2[%c0_2, %c0_3] : memref<128x128xbf16, #tpu.memory_space<vmem>>, vector<128x128xbf16>
    %c0_4 = arith.constant 0 : index
    %c0_5 = arith.constant 0 : index
    %5 = vector.load %arg3[%c0_4, %c0_5] : memref<128x128xbf16, #tpu.memory_space<vmem>>, vector<128x128xbf16>
    %cst = arith.constant dense<0.000000e+00> : vector<128x128xf32>
    %6 = tpu.matmul %4, %5, %cst {dimension_numbers = #tpu.dot_dimension_numbers<[1], [0], [0], [1], [0, 0, 1, 1], [], []>} : vector<128x128xbf16>, vector<128x128xbf16>, vector<128x128xf32> -> vector<128x128xf32>
    %7 = arith.addf %3, %6 : vector<128x128xf32>
    %c0_6 = arith.constant 0 : index
    %c0_7 = arith.constant 0 : index
    %8 = vector.load %arg7[%c0_6, %c0_7] : memref<128x128xf32, #tpu.memory_space<vmem>>, vector<128x128xf32>
    tpu.vector_store %arg7[%c0_6, %c0_7], %7 {strides = array<i32>} : memref<128x128xf32, #tpu.memory_space<vmem>>, vector<128x128xf32>,
    %c1_i32 = arith.constant 1 : i32
    %9 = arith.cmpi eq, %arg1, %c1_i32 : i32
    %10 = arith.extui %9 : i1 to i32
    %c0_i32_8 = arith.constant 0 : i32
    %11 = arith.cmpi ne, %10, %c0_i32_8 : i32
    scf.if %11 {
      %c0_9 = arith.constant 0 : index
      %c0_10 = arith.constant 0 : index
      %12 = vector.load %arg7[%c0_9, %c0_10] : memref<128x128xf32, #tpu.memory_space<vmem>>, vector<128x128xf32>
      %c0_11 = arith.constant 0 : index
      %c0_12 = arith.constant 0 : index
      %13 = vector.load %arg4[%c0_11, %c0_12] : memref<128x128xf32, #tpu.memory_space<vmem>>, vector<128x128xf32>
      %cst_13 = arith.constant dense<0.000000e+00> : vector<128x128xf32>
      %14 = tpu.matmul %12, %13, %cst_13 {dimension_numbers = #tpu.dot_dimension_numbers<[1], [0], [0], [1], [0, 0, 1, 1], [], []>} : vector<128x128xf32>, vector<128x128xf32>, vector<128x128xf32> -> vector<128x128xf32>
      %c0_14 = arith.constant 0 : index
      %c0_15 = arith.constant 0 : index
      %15 = vector.load %arg5[%c0_14, %c0_15] : memref<1x128xf32, #tpu.memory_space<vmem>>, vector<1x128xf32>
      %16 = vector.broadcast %15 : vector<1x128xf32> to vector<128x128xf32>
      %17 = arith.addf %14, %16 : vector<128x128xf32>
      %18 = tpu.iota {dimensions = array<i32: 1>} : vector<128x128xi32>
      %c8_i32 = arith.constant 8 : i32
      %19 = vector.broadcast %c8_i32 : i32 to vector<128x128xi32>
      %20 = arith.cmpi slt, %18, %19 : vector<128x128xi32>
      %cst_16 = arith.constant -1.000000e+30 : f32
      %21 = vector.broadcast %cst_16 : f32 to vector<128x128xf32>
      %22 = arith.select %20, %17, %21 : vector<128x128xi1>, vector<128x128xf32>
      %cst_17 = arith.constant dense<0xFF800000> : vector<128xf32>
      %23 = vector.multi_reduction <maximumf>, %22, %cst_17 [1] : vector<128x128xf32> to vector<128xf32>
      %24 = vector.shape_cast %23 : vector<128xf32> to vector<128x1xf32>
      %25 = vector.broadcast %24 : vector<128x1xf32> to vector<128x128xf32>
      %26 = arith.subf %22, %25 : vector<128x128xf32>
      %27 = math.exp %26 : vector<128x128xf32>
      %cst_18 = arith.constant dense<0.000000e+00> : vector<128xf32>
      %28 = vector.multi_reduction <add>, %27, %cst_18 [1] : vector<128x128xf32> to vector<128xf32>
      %29 = vector.shape_cast %28 : vector<128xf32> to vector<128x1xf32>
      %30 = math.log %29 : vector<128x1xf32>
      %31 = vector.broadcast %30 : vector<128x1xf32> to vector<128x128xf32>
      %32 = arith.subf %26, %31 : vector<128x128xf32>
      %c0_19 = arith.constant 0 : index
      %c0_20 = arith.constant 0 : index
      %33 = vector.load %arg6[%c0_19, %c0_20] : memref<128x128xf32, #tpu.memory_space<vmem>>, vector<128x128xf32>
      tpu.vector_store %arg6[%c0_19, %c0_20], %32 {strides = array<i32>} : memref<128x128xf32, #tpu.memory_space<vmem>>, vector<128x128xf32>,
    } else {
    }
    return
  }
  func.func @transform_0(%arg0: i32, %arg1: i32) -> (i32, i32) {
    %c0_i32 = arith.constant 0 : i32
    return %arg0, %arg1 : i32, i32
  }
  func.func @transform_1(%arg0: i32, %arg1: i32) -> (i32, i32) {
    %c0_i32 = arith.constant 0 : i32
    %c0_i32_0 = arith.constant 0 : i32
    return %arg1, %c0_i32 : i32, i32
  }
  func.func @transform_2(%arg0: i32, %arg1: i32) -> (i32, i32) {
    %c0_i32 = arith.constant 0 : i32
    %c0_i32_0 = arith.constant 0 : i32
    %c0_i32_1 = arith.constant 0 : i32
    return %c0_i32, %c0_i32_0 : i32, i32
  }
  func.func @transform_3(%arg0: i32, %arg1: i32) -> (i32, i32) {
    %c0_i32 = arith.constant 0 : i32
    %c0_i32_0 = arith.constant 0 : i32
    %c0_i32_1 = arith.constant 0 : i32
    return %c0_i32, %c0_i32_0 : i32, i32
  }
  func.func @transform_4(%arg0: i32, %arg1: i32) -> (i32, i32) {
    %c0_i32 = arith.constant 0 : i32
    %c0_i32_0 = arith.constant 0 : i32
    return %arg0, %c0_i32 : i32, i32
  }
}

</mosaic_0001>

<bundles_post_ra>
// kernel: gcn_forward.3
= control target key start
LH: loop header
LB: loop body
LE: loop exit
PB: predicated region body
PF: predicated region fallthrough
CT: control target
= control target key end

     0   :  { %s1560_s15 = smov 0   ;;  %s1562_s16 = smov 0   ;;  %s1876_s0 = inlined_call_operand.vmem [shape: bf16[256,256], index: 0, kind: input, shape index: {}]   ;;  %s1877_s1 = inlined_call_operand.vmem [shape: bf16[256,128], index: 1, kind: input, shape index: {}]   ;;  %s1878_s2 = inlined_call_operand.vmem [shape: f32[128,128], index: 2, kind: input, shape index: {}]   ;;  %s1879_s3 = inlined_call_operand.vmem [shape: f32[1,128], index: 3, kind: input, shape index: {}]   ;;  %s1880_s4 = inlined_call_operand.vmem [shape: f32[256,128], index: 4, kind: output, shape index: {}]  }
   0x1   :  { %s1564_s17 = smov 0   ;;  %s1566_s18 = smov 0  }
   0x2   :  { %s1568_s19 = smov 0   ;;  %s1570_s20 = smov 0  }
   0x3   :  { %s1572_s21 = smov 0  }
   0x4 LB: > { %s23_s22 = sadd.s32 1, %s1524_s19  ;;  %s26_s23 = sadd.s32 1, %s1528_s20  ;;  %s1532_s21 = sphi %s1572_s21, %s14_s21   ;;  %s1528_s20 = sphi %s1570_s20, %s1886_s20   ;;  %s1524_s19 = sphi %s1568_s19, %s1885_s19   ;;  %s1520_s18 = sphi %s1566_s18, %s1884_s18   ;;  %s1516_s17 = sphi %s1564_s17, %s1883_s17   ;;  %s1512_s16 = sphi %s1562_s16, %s1882_s16   ;;  %s1508_s15 = sphi %s1560_s15, %s1881_s15  }
   0x5   : > { %p24_p0 = scmp.ge.s32.totalorder %s23_s22, 2  ;;  %p42_p1 = scmp.ne.s32.totalorder %s1512_s16, %s1508_s15 }
   0x6   : > { %p43_p2 = scmp.eq.s32.totalorder %s1532_s21, 0  ;;  %s35_s27 = sadd.s32 1, %s1512_s16 }
   0x7   : > { %s1888_s22 = smov (%p24_p0, %s23_s22), 0  ;;  %s1890_s23 = smov (!%p24_p0, %s26_s23), %s1528_s20 }
   0x8   : > { %p44_p3 = por %p43_p2, %p42_p1  ;;  %p28_p4 = scmp.ge.s32.totalorder %s1890_s23, 2 }
   0x9   : > { %s31_s24 = ssub.s32 %s1524_s19, %s1888_s22  ;;  %p1108_p6 = scmp.ge.s32.totalorder %s1532_s21, 4 }
   0xa   : > { %s1892_s23 = smov (%p28_p4, %s1890_s23), 0 }
   0xb   : > { %s30_s25 = ssub.s32 %s1528_s20, %s1892_s23  ;;  %168 = sbr.rel (%p1108_p6) target bundleno = 34 (0x22), region = 24 }
   0xc   : > { %s32_s26 = sor.u32 %s31_s24, %s30_s25 }
   0xd   : > { %p33_p5 = scmp.eq.s32.totalorder %s32_s26, 0 }
   0xf   : > { %s1611_s28 = scalar_select %p33_p5, %s1512_s16, %s35_s27  }
  0x12   : > { %171 = sbr.rel (!%p44_p3) target bundleno = 34 (0x22), region = 28  ;;  %s173_s29 = sand.u32 (%p44_p3), 1, %s1512_s16  }
  0x13   : > { %s1140_s30 = sshll.u32 (%p44_p3), %s1528_s20, 5  ;;  %s1109_s5 = sshll.u32 (%p44_p3), %s173_s29, 6 }
  0x14   : > { %s178_s6 = sadd.s32 (%p44_p3), %s1524_s19, %s1140_s30  ;;  %s175_s11 = scalar_lea.vmem (%p44_p3), [#allocation3], %s1109_s5 }
  0x15   : > { %s1112_s7 = sshll.u32 (%p44_p3), %s178_s6, 2 }
  0x16   : > { %s1620_s10 = scalar_lea.vmem (%p44_p3), %s1876_s0, %s1112_s7 }
  0x17   : > { %v196_v0 = vld [vmem:[%s1620_s10] sm:$0xf] (%p44_p3)  ;;  %v198_v1 = vld [vmem:[%s1620_s10 + $0x8] sm:$0xf] (%p44_p3)  ;;  %v200_v2 = vld [vmem:[%s1620_s10 + $0x10] sm:$0xf] (%p44_p3) }
  0x18   : > { %197 = vst [vmem:[%s175_s11] sm:$0xf] (%p44_p3), %v196_v0  ;;  %199 = vst [vmem:[%s175_s11 + $0x4] sm:$0xf] (%p44_p3), %v198_v1  ;;  %v202_v3 = vld [vmem:[%s1620_s10 + $0x18] sm:$0xf] (%p44_p3) }
  0x19   : > { %201 = vst [vmem:[%s175_s11 + $0x8] sm:$0xf] %v200_v2  ;;  %v204_v4 = vld [vmem:[%s1620_s10 + $0x20] sm:$0xf]  ;;  %v206_v5 = vld [vmem:[%s1620_s10 + $0x28] sm:$0xf] }
  0x1a   : > { %203 = vst [vmem:[%s175_s11 + $0xc] sm:$0xf] %v202_v3  ;;  %205 = vst [vmem:[%s175_s11 + $0x10] sm:$0xf] %v204_v4  ;;  %v208_v6 = vld [vmem:[%s1620_s10 + $0x30] sm:$0xf] }
  0x1b   : > { %207 = vst [vmem:[%s175_s11 + $0x14] sm:$0xf] %v206_v5  ;;  %v210_v7 = vld [vmem:[%s1620_s10 + $0x38] sm:$0xf]  ;;  %v212_v8 = vld [vmem:[%s1620_s10 + $0x40] sm:$0xf] }
  0x1c   : > { %209 = vst [vmem:[%s175_s11 + $0x18] sm:$0xf] %v208_v6  ;;  %211 = vst [vmem:[%s175_s11 + $0x1c] sm:$0xf] %v210_v7  ;;  %v214_v9 = vld [vmem:[%s1620_s10 + $0x48] sm:$0xf] }
  0x1d   : > { %213 = vst [vmem:[%s175_s11 + $0x20] sm:$0xf] %v212_v8  ;;  %v216_v10 = vld [vmem:[%s1620_s10 + $0x50] sm:$0xf]  ;;  %v218_v11 = vld [vmem:[%s1620_s10 + $0x58] sm:$0xf] }
  0x1e   : > { %215 = vst [vmem:[%s175_s11 + $0x24] sm:$0xf] %v214_v9  ;;  %217 = vst [vmem:[%s175_s11 + $0x28] sm:$0xf] %v216_v10  ;;  %v220_v12 = vld [vmem:[%s1620_s10 + $0x60] sm:$0xf] }
  0x1f   : > { %219 = vst [vmem:[%s175_s11 + $0x2c] sm:$0xf] %v218_v11  ;;  %v222_v13 = vld [vmem:[%s1620_s10 + $0x68] sm:$0xf]  ;;  %v224_v14 = vld [vmem:[%s1620_s10 + $0x70] sm:$0xf] }
  0x20   : > { %221 = vst [vmem:[%s175_s11 + $0x30] sm:$0xf] %v220_v12  ;;  %223 = vst [vmem:[%s175_s11 + $0x34] sm:$0xf] %v222_v13  ;;  %v226_v15 = vld [vmem:[%s1620_s10 + $0x78] sm:$0xf] }
  0x21   : > { %225 = vst [vmem:[%s175_s11 + $0x38] sm:$0xf] %v224_v14  ;;  %227 = vst [vmem:[%s175_s11 + $0x3c] sm:$0xf] %v226_v15 }
  0x22 PF: > { %p1113_p7 = scmp.ge.s32.totalorder %s1532_s21, 1  ;;  %p290_p8 = scmp.lt.s32.totalorder %s1532_s21, 5 }
  0x24   : > { %p291_p9 = pnand %p1113_p7, %p290_p8 }
  0x25   : > { %s297_s12 = sand.u32 (!%p291_p9), 1, %s1508_s15   ;;  %s1115_s13 = sshll.u32 (!%p291_p9), %s1516_s17, 4 }
  0x26   : > { %294 = sbr.rel (%p291_p9) target bundleno = 883 (0x373), region = 73  ;;  %s1114_s14 = sshll.u32 (!%p291_p9), %s297_s12, 6 }
  0x27   : > { %p329_p10 = scmp.lt.s32.totalorder (!%p291_p9), %s1115_s13, 31  ;;  %s1117_s24 = sshll.u32 (!%p291_p9), %s1520_s18, 4 }
  0x28   : > { %p335_p11 = scmp.lt.s32.totalorder (!%p291_p9), %s1117_s24, 31  ;;  %s1653_s15 = scalar_lea.vmem (!%p291_p9), [#allocation3], %s1114_s14 }
  0x29   : > { %p1119_p12 = scmp.ne.s32.totalorder (!%p291_p9), %s1516_s17, 0 }
  0x2d   : > { %s1894_s13 = smov (!%p329_p10, %s1115_s13), 31  ;;  %s1896_s24 = smov (!%p335_p11, %s1117_s24), 31 }
  0x2e   : > { %s1116_s25 = sshll.u32 %s1894_s13, 2  ;;  %s1118_s30 = sshll.u32 %s1896_s24, 3  ;;  %v1534_v16 = vmov (!%p1119_p12), 0.0  }
  0x2f   : > { %s1646_s29 = scalar_lea.vmem %s1877_s1, %s1116_s25  ;;  %s1651_s7 = scalar_lea.vmem %s1880_s4, %s1118_s30  ;;  %345 = vst [vmem:[#allocation2] sm:$0xff] (!%p1119_p12), %v1534_v16  ;;  %346 = vst [vmem:[#allocation2 + $0x8] sm:$0xff] (!%p1119_p12), %v1534_v16 }
  0x30   : > { %344 = sbr.rel (%p1119_p12) target bundleno = 55 (0x37), region = 81  ;;  %347 = vst [vmem:[#allocation2 + $0x10] sm:$0xff] (!%p1119_p12), %v1534_v16  ;;  %348 = vst [vmem:[#allocation2 + $0x18] sm:$0xff] (!%p1119_p12), %v1534_v16 }
  0x31   : > { %349 = vst [vmem:[#allocation2 + $0x20] sm:$0xff] (!%p1119_p12), %v1534_v16  ;;  %350 = vst [vmem:[#allocation2 + $0x28] sm:$0xff] (!%p1119_p12), %v1534_v16 }
  0x32   : > { %351 = vst [vmem:[#allocation2 + $0x30] sm:$0xff] (!%p1119_p12), %v1534_v16  ;;  %352 = vst [vmem:[#allocation2 + $0x38] sm:$0xff] (!%p1119_p12), %v1534_v16 }
  0x33   : > { %353 = vst [vmem:[#allocation2 + $0x40] sm:$0xff] (!%p1119_p12), %v1534_v16  ;;  %354 = vst [vmem:[#allocation2 + $0x48] sm:$0xff] (!%p1119_p12), %v1534_v16 }
  0x34   : > { %355 = vst [vmem:[#allocation2 + $0x50] sm:$0xff] (!%p1119_p12), %v1534_v16  ;;  %356 = vst [vmem:[#allocation2 + $0x58] sm:$0xff] (!%p1119_p12), %v1534_v16 }
  0x35   : > { %357 = vst [vmem:[#allocation2 + $0x60] sm:$0xff] (!%p1119_p12), %v1534_v16  ;;  %358 = vst [vmem:[#allocation2 + $0x68] sm:$0xff] (!%p1119_p12), %v1534_v16 }
  0x36   : > { %359 = vst [vmem:[#allocation2 + $0x70] sm:$0xff] (!%p1119_p12), %v1534_v16  ;;  %360 = vst [vmem:[#allocation2 + $0x78] sm:$0xff] (!%p1119_p12), %v1534_v16 }
  0x37 PF: > { %v1398_v17 = vld [vmem:[%s1646_s29] sm:$0xff]   ;;  %v1399_v18 = vld [vmem:[%s1646_s29 + $0x8] sm:$0xff]   ;;  %v1400_v19 = vld [vmem:[%s1646_s29 + $0x10] sm:$0xff]   ;;  %p1136_p13 = scmp.ne.s32.totalorder %s1516_s17, 1 }
  0x38   : > { %1189 = vmatprep.subr.bf16.mxu0 %v1398_v17  ;;  %1309 = vmatprep.subr.bf16.mxu1 %v1398_v17  ;;  %v1401_v20 = vld [vmem:[%s1646_s29 + $0x18] sm:$0xff]   ;;  %v1406_v21 = vld [vmem:[%s1653_s15] sm:$0xff]   ;;  %v1403_v24 = vld [vmem:[%s1646_s29 + $0x28] sm:$0xff]  }
  0x39   : > { %1190 = vmatpush3.bf16.msra.mxu0 %v1398_v17  ;;  %1317 = vmatpush3.bf16.msra.mxu1 %v1398_v17  ;;  %v1407_v22 = vld [vmem:[%s1653_s15 + $0x20] sm:$0xff]   ;;  %v1404_v25 = vld [vmem:[%s1646_s29 + $0x30] sm:$0xff]   ;;  %v1405_v26 = vld [vmem:[%s1646_s29 + $0x38] sm:$0xff]  }
  0x3a   : > { %1191 = vmatprep.subr.bf16.mxu0 %v1399_v18  ;;  %1310 = vmatprep.subr.bf16.mxu1 %v1399_v18  ;;  %v1402_v23 = vld [vmem:[%s1646_s29 + $0x20] sm:$0xff]   ;;  %v1408_v27 = vld [vmem:[%s1653_s15 + $0x8] sm:$0xff]   ;;  %v1410_v29 = vld [vmem:[%s1653_s15 + $0x10] sm:$0xff]  }
  0x3b   : > { %1205 = vmatprep.mubr.bf16.mxu0 %v1406_v21  ;;  %1213 = vmatprep.mubr.bf16.mxu1 %v1407_v22  ;;  %v1409_v28 = vld [vmem:[%s1653_s15 + $0x28] sm:$0xff]   ;;  %v1411_v30 = vld [vmem:[%s1653_s15 + $0x30] sm:$0xff]   ;;  %v1412_v31 = vld [vmem:[%s1653_s15 + $0x18] sm:$0xff]  }
  0x3c   : > { %v1413_v32 = vld [vmem:[%s1653_s15 + $0x38] sm:$0xff]   ;;  %v363_v33 = vld [vmem:[#allocation2 + $0x10] sm:$0xff]  ;;  %v361_v35 = vld [vmem:[#allocation2] sm:$0xff] }
  0x3d   : > { %1192 = vmatpush3.bf16.msra.mxu0 %v1399_v18  ;;  %1318 = vmatpush3.bf16.msra.mxu1 %v1399_v18  ;;  %v371_v34 = vld [vmem:[#allocation2 + $0x50] sm:$0xff]  ;;  %v369_v36 = vld [vmem:[#allocation2 + $0x40] sm:$0xff]  ;;  %v364_v39 = vld [vmem:[#allocation2 + $0x18] sm:$0xff] }
  0x3e   : > { %1193 = vmatprep.subr.bf16.mxu0 %v1400_v19  ;;  %1311 = vmatprep.subr.bf16.mxu1 %v1400_v19  ;;  %v372_v40 = vld [vmem:[#allocation2 + $0x58] sm:$0xff]  ;;  %v362_v45 = vld [vmem:[#allocation2 + $0x8] sm:$0xff]  ;;  %v367_v57 = vld [vmem:[#allocation2 + $0x30] sm:$0xff] }
  0x3f   : > { %v370_v46 = vld [vmem:[#allocation2 + $0x48] sm:$0xff]  ;;  %v375_v58 = vld [vmem:[#allocation2 + $0x70] sm:$0xff]  ;;  %v365_v59 = vld [vmem:[#allocation2 + $0x20] sm:$0xff] }
  0x40   : > { %v373_v60 = vld [vmem:[#allocation2 + $0x60] sm:$0xff]  ;;  %v368_v63 = vld [vmem:[#allocation2 + $0x38] sm:$0xff]  ;;  %v366_v5 = vld [vmem:[#allocation2 + $0x28] sm:$0xff] }
  0x41   : > { %1194 = vmatpush3.bf16.msra.mxu0 %v1400_v19  ;;  %1319 = vmatpush3.bf16.msra.mxu1 %v1400_v19  ;;  %v376_v0 = vld [vmem:[#allocation2 + $0x78] sm:$0xff]  ;;  %v374_v6 = vld [vmem:[#allocation2 + $0x68] sm:$0xff]  ;;  %v654_v17 = vld [vmem:[%s1878_s2] sm:$0xff] (!%p1136_p13) }
  0x42   : > { %1195 = vmatprep.subr.bf16.mxu0 %v1401_v20  ;;  %1312 = vmatprep.subr.bf16.mxu1 %v1401_v20  ;;  %v655_v18 = vld [vmem:[%s1878_s2 + $0x8] sm:$0xff] (!%p1136_p13)  ;;  %v656_v19 = vld [vmem:[%s1878_s2 + $0x10] sm:$0xff] (!%p1136_p13)  ;;  %v657_v21 = vld [vmem:[%s1878_s2 + $0x18] sm:$0xff] (!%p1136_p13) }
  0x43   : > { %v1281_v22 = vpack.c.bf16 (!%p1136_p13), %v657_v21, %v656_v19 }
  0x45   : > { %1196 = vmatpush3.bf16.msra.mxu0 %v1401_v20  ;;  %1320 = vmatpush3.bf16.msra.mxu1 %v1401_v20  ;;  %v1277_v20 = vpack.c.bf16 (!%p1136_p13), %v655_v18, %v654_v17 }
  0x46   : > { %1197 = vmatprep.subr.bf16.mxu0 %v1402_v23  ;;  %1313 = vmatprep.subr.bf16.mxu1 %v1402_v23 }
  0x49   : > { %1198 = vmatpush3.bf16.msra.mxu0 %v1402_v23  ;;  %1321 = vmatpush3.bf16.msra.mxu1 %v1402_v23  ;;  %v658_v23 = vld [vmem:[%s1878_s2 + $0x20] sm:$0xff] (!%p1136_p13) }
  0x4a   : > { %1199 = vmatprep.subr.bf16.mxu0 %v1403_v24  ;;  %1314 = vmatprep.subr.bf16.mxu1 %v1403_v24 }
  0x4d   : > { %1200 = vmatpush3.bf16.msra.mxu0 %v1403_v24  ;;  %1322 = vmatpush3.bf16.msra.mxu1 %v1403_v24  ;;  %v659_v24 = vld [vmem:[%s1878_s2 + $0x28] sm:$0xff] (!%p1136_p13) }
  0x4e   : > { %1201 = vmatprep.subr.bf16.mxu0 %v1404_v25  ;;  %1315 = vmatprep.subr.bf16.mxu1 %v1404_v25 }
  0x51   : > { %1202 = vmatpush3.bf16.msra.mxu0 %v1404_v25  ;;  %1323 = vmatpush3.bf16.msra.mxu1 %v1404_v25  ;;  %v1285_v25 = vpack.c.bf16 (!%p1136_p13), %v659_v24, %v658_v23 }
  0x52   : > { %1203 = vmatprep.subr.bf16.mxu0 %v1405_v26  ;;  %1316 = vmatprep.subr.bf16.mxu1 %v1405_v26 }
  0x55   : > { %1204 = vmatpush3.bf16.msra.mxu0 %v1405_v26  ;;  %1324 = vmatpush3.bf16.msra.mxu1 %v1405_v26 }
  0x56   : > { %1278 = vmatprep.subr.bf16.mxu0 (!%p1136_p13), %v1277_v20  ;;  %1325 = vmatprep.subr.bf16.mxu1 (!%p1136_p13), %v1277_v20 }
  0x58   : > { %1206 = vmatmul.mubr.bf16.vlgmr.msra.gmra.mrb[0].mxu0 %v1408_v27  ;;  %1214 = vmatmul.mubr.bf16.vlgmr.msra.gmra.mrb[0].mxu1 %v1409_v28  ;;  %v660_v28 = vld [vmem:[%s1878_s2 + $0x30] sm:$0xff] (!%p1136_p13) }
  0x59   : > { %1209 = vmatprep.mubr.bf16.mxu0 %v1410_v29  ;;  %1217 = vmatprep.mubr.bf16.mxu1 %v1411_v30  ;;  %v661_v29 = vld [vmem:[%s1878_s2 + $0x38] sm:$0xff] (!%p1136_p13) }
  0x5a   : > { %1280 = vmatpush3.bf16.msra.mxu0 (!%p1136_p13), %v1277_v20  ;;  %1333 = vmatpush3.bf16.msra.mxu1 (!%p1136_p13), %v1277_v20  ;;  %v1289_v30 = vpack.c.bf16 (!%p1136_p13), %v661_v29, %v660_v28 }
  0x5b   : > { %1282 = vmatprep.subr.bf16.mxu0 (!%p1136_p13), %v1281_v22  ;;  %1326 = vmatprep.subr.bf16.mxu1 (!%p1136_p13), %v1281_v22 }
  0x5e   : > { %1284 = vmatpush3.bf16.msra.mxu0 (!%p1136_p13), %v1281_v22  ;;  %1334 = vmatpush3.bf16.msra.mxu1 (!%p1136_p13), %v1281_v22 }
  0x5f   : > { %1286 = vmatprep.subr.bf16.mxu0 (!%p1136_p13), %v1285_v25  ;;  %1327 = vmatprep.subr.bf16.mxu1 (!%p1136_p13), %v1285_v25 }
  0x60   : > { %1210 = vmatmul.mubr.bf16.gmra.mrb[4].mxu0 %v1412_v31  ;;  %1218 = vmatmul.mubr.bf16.gmra.mrb[4].mxu1 %v1413_v32  ;;  %v662_v31 = vld [vmem:[%s1878_s2 + $0x40] sm:$0xff] (!%p1136_p13)  ;;  %v663_v32 = vld [vmem:[%s1878_s2 + $0x48] sm:$0xff] (!%p1136_p13) }
  0x62   : > { %1288 = vmatpush3.bf16.msra.mxu0 (!%p1136_p13), %v1285_v25  ;;  %1335 = vmatpush3.bf16.msra.mxu1 (!%p1136_p13), %v1285_v25 }
  0x63   : > { %1290 = vmatprep.subr.bf16.mxu0 (!%p1136_p13), %v1289_v30  ;;  %1328 = vmatprep.subr.bf16.mxu1 (!%p1136_p13), %v1289_v30 }
  0x66   : > { %1292 = vmatpush3.bf16.msra.mxu0 (!%p1136_p13), %v1289_v30  ;;  %1336 = vmatpush3.bf16.msra.mxu1 (!%p1136_p13), %v1289_v30 }
 0x12b   : > { %v1207_v37 = vpop.f32.mrb[0].mxu0  ;;  %v1215_v38 = vpop.f32.mrb[0].mxu1 }
 0x12c   : > { %v604_v41 = vadd.f32 %v1207_v37, %v363_v33  ;;  %v612_v42 = vadd.f32 %v1215_v38, %v371_v34  ;;  %v539_v43 = vpop.f32.mrb[1].mxu0  ;;  %v571_v44 = vpop.f32.mrb[1].mxu1  ;;  %v1293_v33 = vpack.c.bf16 (!%p1136_p13), %v663_v32, %v662_v31  ;;  %v664_v34 = vld [vmem:[%s1878_s2 + $0x50] sm:$0xff] (!%p1136_p13)  ;;  %v666_v37 = vld [vmem:[%s1878_s2 + $0x60] sm:$0xff] (!%p1136_p13)  ;;  %v667_v38 = vld [vmem:[%s1878_s2 + $0x68] sm:$0xff] (!%p1136_p13) }
 0x12d   : > { %v602_v47 = vadd.f32 %v539_v43, %v361_v35  ;;  %v610_v48 = vadd.f32 %v571_v44, %v369_v36  ;;  %v1208_v49 = vpop.f32.mrb[2].mxu0  ;;  %v1216_v50 = vpop.f32.mrb[2].mxu1  ;;  %v665_v35 = vld [vmem:[%s1878_s2 + $0x58] sm:$0xff] (!%p1136_p13) }
 0x12e   : > { %620 = vst [vmem:[#allocation2 + $0x10] sm:$0xff] %v604_v41  ;;  %628 = vst [vmem:[#allocation2 + $0x50] sm:$0xff] %v612_v42  ;;  %v605_v51 = vadd.f32 %v1208_v49, %v364_v39  ;;  %v613_v52 = vadd.f32 %v1216_v50, %v372_v40  ;;  %v542_v53 = vpop.f32.mrb[3].mxu0  ;;  %v574_v54 = vpop.f32.mrb[3].mxu1  ;;  %1294 = vmatprep.subr.bf16.mxu0 (!%p1136_p13), %v1293_v33  ;;  %1329 = vmatprep.subr.bf16.mxu1 (!%p1136_p13), %v1293_v33  ;;  %v668_v40 = vld [vmem:[%s1878_s2 + $0x70] sm:$0xff] (!%p1136_p13)  ;;  %v669_v41 = vld [vmem:[%s1878_s2 + $0x78] sm:$0xff] (!%p1136_p13) }
 0x12f   : > { %618 = vst [vmem:[#allocation2] sm:$0xff] %v602_v47  ;;  %626 = vst [vmem:[#allocation2 + $0x40] sm:$0xff] %v610_v48  ;;  %v603_v55 = vadd.f32 %v542_v53, %v362_v45  ;;  %v611_v56 = vadd.f32 %v574_v54, %v370_v46  ;;  %v1297_v36 = vpack.c.bf16 (!%p1136_p13), %v665_v35, %v664_v34  ;;  %1296 = vmatpush3.bf16.msra.mxu0 (!%p1136_p13), %v1293_v33 }
 0x130   : > { %621 = vst [vmem:[#allocation2 + $0x18] sm:$0xff] %v605_v51  ;;  %629 = vst [vmem:[#allocation2 + $0x58] sm:$0xff] %v613_v52  ;;  %1337 = vmatpush3.bf16.msra.mxu1 (!%p1136_p13), %v1293_v33  ;;  %v1301_v39 = vpack.c.bf16 (!%p1136_p13), %v667_v38, %v666_v37  ;;  %v1305_v42 = vpack.c.bf16 (!%p1136_p13), %v669_v41, %v668_v40 }
 0x131   : > { %619 = vst [vmem:[#allocation2 + $0x8] sm:$0xff] %v603_v55  ;;  %627 = vst [vmem:[#allocation2 + $0x48] sm:$0xff] %v611_v56  ;;  %1298 = vmatprep.subr.bf16.mxu0 (!%p1136_p13), %v1297_v36  ;;  %1330 = vmatprep.subr.bf16.mxu1 (!%p1136_p13), %v1297_v36 }
 0x133   : > { %v1211_v61 = vpop.f32.mrb[4].mxu0  ;;  %v1219_v62 = vpop.f32.mrb[4].mxu1  ;;  %637 = sbr.rel (%p1136_p13) target bundleno = 883 (0x373), region = 85  ;;  %1300 = vmatpush3.bf16.msra.mxu0 (!%p1136_p13), %v1297_v36 }
 0x134   : > { %v608_v1 = vadd.f32 %v1211_v61, %v367_v57  ;;  %v616_v2 = vadd.f32 %v1219_v62, %v375_v58  ;;  %v555_v3 = vpop.f32.mrb[5].mxu0  ;;  %v587_v4 = vpop.f32.mrb[5].mxu1  ;;  %1338 = vmatpush3.bf16.msra.mxu1 (!%p1136_p13), %v1297_v36  ;;  %1302 = vmatprep.subr.bf16.mxu0 (!%p1136_p13), %v1301_v39  ;;  %v822_v57 = vlaneseq (!%p1136_p13) }
 0x135   : > { %v606_v7 = vadd.f32 %v555_v3, %v365_v59  ;;  %v614_v8 = vadd.f32 %v587_v4, %v373_v60  ;;  %v1212_v9 = vpop.f32.mrb[6].mxu0  ;;  %v1220_v10 = vpop.f32.mrb[6].mxu1  ;;  %1331 = vmatprep.subr.bf16.mxu1 (!%p1136_p13), %v1301_v39  ;;  %v640_v45 = vld [vmem:[#allocation2 + $0x10] sm:$0xff] (!%p1136_p13)  ;;  %v1137_v59 = vld [vmem:[%s1879_s3] ss:$0 sm:$0xff] (!%p1136_p13) }
 0x136   : > { %624 = vst [vmem:[#allocation2 + $0x30] sm:$0xff] %v608_v1  ;;  %632 = vst [vmem:[#allocation2 + $0x70] sm:$0xff] %v616_v2  ;;  %v609_v11 = vadd.f32 %v1212_v9, %v368_v63  ;;  %v617_v12 = vadd.f32 %v1220_v10, %v376_v0  ;;  %v558_v13 = vpop.f32.mrb[7].mxu0  ;;  %v590_v14 = vpop.f32.mrb[7].mxu1  ;;  %v638_v26 = vld [vmem:[#allocation2] sm:$0xff] (!%p1136_p13)  ;;  %v648_v46 = vld [vmem:[#allocation2 + $0x50] sm:$0xff] (!%p1136_p13) }
 0x137   : > { %622 = vst [vmem:[#allocation2 + $0x20] sm:$0xff] %v606_v7  ;;  %630 = vst [vmem:[#allocation2 + $0x60] sm:$0xff] %v614_v8  ;;  %v607_v15 = vadd.f32 %v558_v13, %v366_v5  ;;  %v615_v16 = vadd.f32 %v590_v14, %v374_v6  ;;  %v646_v27 = vld [vmem:[#allocation2 + $0x40] sm:$0xff] (!%p1136_p13)  ;;  %1253 = vmatprep.mubr.f32.mxu0 (!%p1136_p13), %v638_v26  ;;  %1304 = vmatpush3.bf16.msra.mxu0 (!%p1136_p13), %v1301_v39  ;;  %v641_v47 = vld [vmem:[#allocation2 + $0x18] sm:$0xff] (!%p1136_p13)  ;;  %v1721_v58 = vand.u32 (!%p1136_p13), 127, %v822_v57 }
 0x138   : > { %625 = vst [vmem:[#allocation2 + $0x38] sm:$0xff] %v609_v11  ;;  %633 = vst [vmem:[#allocation2 + $0x78] sm:$0xff] %v617_v12  ;;  %1265 = vmatprep.mubr.f32.mxu1 (!%p1136_p13), %v646_v27  ;;  %1339 = vmatpush3.bf16.msra.mxu1 (!%p1136_p13), %v1301_v39  ;;  %v639_v43 = vld [vmem:[#allocation2 + $0x8] sm:$0xff] (!%p1136_p13)  ;;  %v649_v48 = vld [vmem:[#allocation2 + $0x58] sm:$0xff] (!%p1136_p13) }
 0x139   : > { %623 = vst [vmem:[#allocation2 + $0x28] sm:$0xff] %v607_v15  ;;  %631 = vst [vmem:[#allocation2 + $0x68] sm:$0xff] %v615_v16  ;;  %1306 = vmatprep.subr.bf16.mxu0 (!%p1136_p13), %v1305_v42  ;;  %1332 = vmatprep.subr.bf16.mxu1 (!%p1136_p13), %v1305_v42  ;;  %v647_v44 = vld [vmem:[#allocation2 + $0x48] sm:$0xff] (!%p1136_p13)  ;;  %vm824_vm0 = vcmp.lt.s32.totalorder (!%p1136_p13), %v1721_v58, 8 }
 0x13b   : > { %1308 = vmatpush3.bf16.msra.mxu0 %v1305_v42 }
 0x13c   : > { %1340 = vmatpush3.bf16.msra.mxu1 %v1305_v42 }
 0x13d   : > { %v644_v53 = vld [vmem:[#allocation2 + $0x30] sm:$0xff] }
 0x13e   : > { %1254 = vmatmul.mubr.f32.vlgmr.msra.gmra.mrb[0].mxu0 %v639_v43  ;;  %v642_v49 = vld [vmem:[#allocation2 + $0x20] sm:$0xff]  ;;  %v652_v54 = vld [vmem:[#allocation2 + $0x70] sm:$0xff] }
 0x13f   : > { %1266 = vmatmul.mubr.f32.vlgmr.msra.gmra.mrb[0].mxu1 %v647_v44  ;;  %1256 = vmatprep.mubr.f32.mxu0 %v640_v45  ;;  %v650_v50 = vld [vmem:[#allocation2 + $0x60] sm:$0xff]  ;;  %v645_v55 = vld [vmem:[#allocation2 + $0x38] sm:$0xff] }
 0x140   : > { %1268 = vmatprep.mubr.f32.mxu1 %v648_v46  ;;  %v643_v51 = vld [vmem:[#allocation2 + $0x28] sm:$0xff]  ;;  %v653_v56 = vld [vmem:[#allocation2 + $0x78] sm:$0xff] }
 0x141   : > { %v651_v52 = vld [vmem:[#allocation2 + $0x68] sm:$0xff] }
 0x142   : > { %1257 = vmatmul.mubr.f32.gmra.mrb[2].mxu0 %v641_v47 }
 0x143   : > { %1269 = vmatmul.mubr.f32.gmra.mrb[2].mxu1 %v649_v48  ;;  %1259 = vmatprep.mubr.f32.mxu0 %v642_v49 }
 0x144   : > { %1271 = vmatprep.mubr.f32.mxu1 %v650_v50 }
 0x146   : > { %1260 = vmatmul.mubr.f32.gmra.mrb[4].mxu0 %v643_v51 }
 0x147   : > { %1272 = vmatmul.mubr.f32.gmra.mrb[4].mxu1 %v651_v52  ;;  %1262 = vmatprep.mubr.f32.mxu0 %v644_v53 }
 0x148   : > { %1274 = vmatprep.mubr.f32.mxu1 %v652_v54 }
 0x14a   : > { %1263 = vmatmul.mubr.f32.gmra.mrb[6].mxu0 %v645_v55 }
 0x14b   : > { %1275 = vmatmul.mubr.f32.gmra.mrb[6].mxu1 %v653_v56 }
 0x211   : > { %v1255_v60 = vpop.f32.mrb[0].mxu0 }
 0x212   : > { %v1267_v61 = vpop.f32.mrb[0].mxu1  ;;  %v749_v62 = vadd.f32 %v1255_v60, %v1137_v59  ;;  %v743_v0 = vpop.f32.mrb[1].mxu0 }
 0x213   : > { %v789_v63 = vadd.f32 %v1267_v61, %v1137_v59  ;;  %v783_v1 = vpop.f32.mrb[1].mxu1  ;;  %v744_v2 = vadd.f32 %v1137_v59, %v743_v0 }
 0x214   : > { %v826_v4 = vsel %vm824_vm0, %v749_v62, -1e+30  ;;  %v784_v11 = vadd.f32 %v1137_v59, %v783_v1 }
 0x215   : > { %v834_v3 = vsel %vm824_vm0, %v789_v63, -1e+30  ;;  %843 = vmax.xlane.f32.xlu0 %v826_v4  ;;  %v1258_v5 = vpop.f32.mrb[2].mxu0  ;;  %v825_v13 = vsel %vm824_vm0, %v744_v2, -1e+30 }
 0x216   : > { %859 = vmax.xlane.f32.xlu1 %v834_v3  ;;  %v1270_v6 = vpop.f32.mrb[2].mxu1  ;;  %v759_v7 = vadd.f32 %v1258_v5, %v1137_v59  ;;  %v753_v8 = vpop.f32.mrb[3].mxu0  ;;  %v833_v21 = vsel %vm824_vm0, %v784_v11, -1e+30 }
 0x217   : > { %v799_v9 = vadd.f32 %v1270_v6, %v1137_v59  ;;  %v793_v10 = vpop.f32.mrb[3].mxu1  ;;  %v754_v19 = vadd.f32 %v1137_v59, %v753_v8 }
 0x218   : > { %v828_v12 = vsel %vm824_vm0, %v759_v7, -1e+30  ;;  %v794_v20 = vadd.f32 %v1137_v59, %v793_v10 }
 0x219   : > { %841 = vmax.xlane.f32.xlu0 %v825_v13  ;;  %v1261_v14 = vpop.f32.mrb[4].mxu0  ;;  %v836_v16 = vsel %vm824_vm0, %v799_v9, -1e+30  ;;  %v827_v28 = vsel %vm824_vm0, %v754_v19, -1e+30 }
 0x21a   : > { %847 = vmax.xlane.f32.xlu1 %v828_v12  ;;  %v1273_v15 = vpop.f32.mrb[4].mxu1  ;;  %v763_v17 = vpop.f32.mrb[5].mxu0  ;;  %v769_v24 = vadd.f32 %v1261_v14, %v1137_v59  ;;  %v835_v29 = vsel %vm824_vm0, %v794_v20, -1e+30 }
 0x21b   : > { %v803_v18 = vpop.f32.mrb[5].mxu1  ;;  %v764_v25 = vadd.f32 %v1137_v59, %v763_v17  ;;  %v809_v30 = vadd.f32 %v1273_v15, %v1137_v59 }
 0x21c   : > { %v804_v31 = vadd.f32 %v1137_v59, %v803_v18  ;;  %v830_v32 = vsel %vm824_vm0, %v769_v24, -1e+30 }
 0x21d   : > { %857 = vmax.xlane.f32.xlu0 %v833_v21  ;;  %v1264_v22 = vpop.f32.mrb[6].mxu0  ;;  %v829_v33 = vsel %vm824_vm0, %v764_v25, -1e+30  ;;  %v838_v36 = vsel %vm824_vm0, %v809_v30, -1e+30 }
 0x21e   : > { %863 = vmax.xlane.f32.xlu1 %v836_v16  ;;  %v1276_v23 = vpop.f32.mrb[6].mxu1  ;;  %v773_v26 = vpop.f32.mrb[7].mxu0  ;;  %v779_v34 = vadd.f32 %v1264_v22, %v1137_v59  ;;  %v837_v37 = vsel %vm824_vm0, %v804_v31, -1e+30 }
 0x21f   : > { %v813_v27 = vpop.f32.mrb[7].mxu1  ;;  %v774_v35 = vadd.f32 %v1137_v59, %v773_v26  ;;  %v819_v38 = vadd.f32 %v1276_v23, %v1137_v59 }
 0x220   : > { %v814_v39 = vadd.f32 %v1137_v59, %v813_v27  ;;  %v1753_v40 = vsel %vm824_vm0, %v779_v34, -1e+30 }
 0x221   : > { %861 = vmax.xlane.f32.xlu0 %v835_v29  ;;  %v1757_v41 = vsel %vm824_vm0, %v774_v35, -1e+30  ;;  %v1763_v42 = vsel %vm824_vm0, %v819_v38, -1e+30 }
 0x222   : > { %845 = vmax.xlane.f32.xlu1 %v827_v28  ;;  %v1767_v43 = vsel %vm824_vm0, %v814_v39, -1e+30 }
 0x225   : > { %849 = vmax.xlane.f32.xlu0 %v829_v33 }
 0x226   : > { %851 = vmax.xlane.f32.xlu1 %v830_v32 }
 0x229   : > { %865 = vmax.xlane.f32.xlu0 %v837_v37 }
 0x22a   : > { %867 = vmax.xlane.f32.xlu1 %v838_v36 }
 0x22d   : > { %853 = vmax.xlane.f32.xlu0 %v1757_v41 }
 0x22e   : > { %855 = vmax.xlane.f32.xlu1 %v1753_v40 }
 0x231   : > { %869 = vmax.xlane.f32.xlu0 %v1767_v43 }
 0x232   : > { %871 = vmax.xlane.f32.xlu1 %v1763_v42 }
 0x2a2   : > { %v844_v45 = vpop.xlane.xlu0 %843 }
 0x2a3   : > { %v860_v44 = vpop.xlane.xlu1 %859  ;;  %v1773_v47 = vsub.f32 %v826_v4, %v844_v45 }
 0x2a4   : > { %v1771_v46 = vsub.f32 %v834_v3, %v860_v44 }
 0x2a5   : > { %v891_v48 = vmul.f32 1.442695, %v1773_v47 }
 0x2a6   : > { %v842_v50 = vpop.xlane.xlu0 %841  ;;  %v907_v51 = vmul.f32 1.442695, %v1771_v46 }
 0x2a7   : > { %v848_v49 = vpop.xlane.xlu1 %847  ;;  %v1779_v53 = vsub.f32 %v825_v13, %v842_v50  ;;  %1414 = vpow2.f32 %v891_v48 }
 0x2a8   : > { %v1777_v52 = vsub.f32 %v828_v12, %v848_v49  ;;  %1416 = vpow2.f32 %v907_v51 }
 0x2a9   : > { %v889_v54 = vmul.f32 1.442695, %v1779_v53 }
 0x2aa   : > { %v858_v56 = vpop.xlane.xlu0 %857  ;;  %v895_v57 = vmul.f32 1.442695, %v1777_v52 }
 0x2ab   : > { %v864_v55 = vpop.xlane.xlu1 %863  ;;  %v1783_v58 = vsub.f32 %v833_v21, %v858_v56  ;;  %1418 = vpow2.f32 %v889_v54 }
 0x2ac   : > { %v1785_v59 = vsub.f32 %v836_v16, %v864_v55  ;;  %1420 = vpow2.f32 %v895_v57 }
 0x2ad   : > { %v905_v60 = vmul.f32 1.442695, %v1783_v58 }
 0x2ae   : > { %v862_v62 = vpop.xlane.xlu0 %861  ;;  %v911_v0 = vmul.f32 1.442695, %v1785_v59 }
 0x2af   : > { %v846_v61 = vpop.xlane.xlu1 %845  ;;  %1422 = vpow2.f32 %v905_v60  ;;  %v1791_v1 = vsub.f32 %v835_v29, %v862_v62 }
 0x2b0   : > { %v1788_v63 = vsub.f32 %v827_v28, %v846_v61 }
 0x2b1   : > { %v1415_v3 = vpop.eup %1414  ;;  %v909_v7 = vmul.f32 1.442695, %v1791_v1 }
 0x2b2   : > { %v893_v2 = vmul.f32 1.442695, %v1788_v63  ;;  %v850_v5 = vpop.xlane.xlu0 %849  ;;  %923 = vadd.xlane.f32.xlu1 %v1415_v3  ;;  %v1417_v9 = vpop.eup %1416 }
 0x2b3   : > { %v852_v4 = vpop.xlane.xlu1 %851  ;;  %v1797_v8 = vsub.f32 %v829_v33, %v850_v5 }
 0x2b4   : > { %1424 = vpow2.f32 %v893_v2  ;;  %v1794_v6 = vsub.f32 %v830_v32, %v852_v4 }
 0x2b5   : > { %1426 = vpow2.f32 %v911_v0  ;;  %v1419_v11 = vpop.eup %1418  ;;  %v897_v15 = vmul.f32 1.442695, %v1797_v8 }
 0x2b6   : > { %v899_v10 = vmul.f32 1.442695, %v1794_v6  ;;  %v866_v13 = vpop.xlane.xlu0 %865  ;;  %939 = vadd.xlane.f32.xlu1 %v1417_v9  ;;  %921 = vadd.xlane.f32.xlu0 %v1419_v11  ;;  %v1421_v17 = vpop.eup %1420 }
 0x2b7   : > { %v868_v12 = vpop.xlane.xlu1 %867  ;;  %v1803_v16 = vsub.f32 %v837_v37, %v866_v13 }
 0x2b8   : > { %1428 = vpow2.f32 %v899_v10  ;;  %v1800_v14 = vsub.f32 %v838_v36, %v868_v12 }
 0x2b9   : > { %1430 = vpow2.f32 %v909_v7  ;;  %v1423_v19 = vpop.eup %1422  ;;  %v913_v23 = vmul.f32 1.442695, %v1803_v16 }
 0x2ba   : > { %v915_v18 = vmul.f32 1.442695, %v1800_v14  ;;  %v854_v21 = vpop.xlane.xlu0 %853  ;;  %927 = vadd.xlane.f32.xlu1 %v1421_v17  ;;  %937 = vadd.xlane.f32.xlu0 %v1423_v19 }
 0x2bb   : > { %v856_v20 = vpop.xlane.xlu1 %855  ;;  %v1811_v24 = vsub.f32 %v1757_v41, %v854_v21 }
 0x2bc   : > { %1432 = vpow2.f32 %v915_v18  ;;  %v1807_v22 = vsub.f32 %v1753_v40, %v856_v20 }
 0x2bd   : > { %1434 = vpow2.f32 %v897_v15  ;;  %v901_v31 = vmul.f32 1.442695, %v1811_v24 }
 0x2be   : > { %v1425_v25 = vpop.eup %1424  ;;  %v903_v26 = vmul.f32 1.442695, %v1807_v22  ;;  %v870_v29 = vpop.xlane.xlu0 %869 }
 0x2bf   : > { %v1427_v27 = vpop.eup %1426  ;;  %v872_v28 = vpop.xlane.xlu1 %871  ;;  %925 = vadd.xlane.f32.xlu0 %v1425_v25  ;;  %v1819_v32 = vsub.f32 %v1767_v43, %v870_v29 }
 0x2c0   : > { %1436 = vpow2.f32 %v903_v26  ;;  %943 = vadd.xlane.f32.xlu1 %v1427_v27  ;;  %v1815_v30 = vsub.f32 %v1763_v42, %v872_v28 }
 0x2c1   : > { %1438 = vpow2.f32 %v913_v23  ;;  %v917_v36 = vmul.f32 1.442695, %v1819_v32 }
 0x2c2   : > { %v1429_v33 = vpop.eup %1428  ;;  %v919_v34 = vmul.f32 1.442695, %v1815_v30 }
 0x2c3   : > { %v1431_v35 = vpop.eup %1430 }
 0x2c4   : > { %1440 = vpow2.f32 %v919_v34  ;;  %931 = vadd.xlane.f32.xlu1 %v1429_v33  ;;  %941 = vadd.xlane.f32.xlu0 %v1431_v35 }
 0x2c5   : > { %1442 = vpow2.f32 %v901_v31 }
 0x2c6   : > { %v1433_v37 = vpop.eup %1432  ;;  %1444 = vpow2.f32 %v917_v36 }
 0x2c7   : > { %v1435_v38 = vpop.eup %1434 }
 0x2c8   : > { %947 = vadd.xlane.f32.xlu1 %v1433_v37  ;;  %929 = vadd.xlane.f32.xlu0 %v1435_v38 }
 0x2ca   : > { %v1437_v39 = vpop.eup %1436 }
 0x2cb   : > { %v1439_v40 = vpop.eup %1438 }
 0x2cc   : > { %935 = vadd.xlane.f32.xlu1 %v1437_v39  ;;  %945 = vadd.xlane.f32.xlu0 %v1439_v40 }
 0x2ce   : > { %v1441_v41 = vpop.eup %1440 }
 0x2cf   : > { %v1443_v42 = vpop.eup %1442 }
 0x2d0   : > { %951 = vadd.xlane.f32.xlu1 %v1441_v41  ;;  %933 = vadd.xlane.f32.xlu0 %v1443_v42  ;;  %v1445_v43 = vpop.eup %1444 }
 0x2d4   : > { %949 = vadd.xlane.f32.xlu0 %v1445_v43 }
 0x33f   : > { %v924_v44 = vpop.xlane.xlu1 %923 }
 0x340   : > { %1446 = vlog2.f32 %v924_v44 }
 0x343   : > { %v940_v45 = vpop.xlane.xlu1 %939  ;;  %v922_v48 = vpop.xlane.xlu0 %921 }
 0x344   : > { %1448 = vlog2.f32 %v940_v45 }
 0x345   : > { %1450 = vlog2.f32 %v922_v48 }
 0x347   : > { %v928_v49 = vpop.xlane.xlu1 %927  ;;  %v938_v50 = vpop.xlane.xlu0 %937 }
 0x348   : > { %1452 = vlog2.f32 %v928_v49 }
 0x349   : > { %1454 = vlog2.f32 %v938_v50 }
 0x34a   : > { %v1447_v51 = vpop.eup %1446 }
 0x34b   : > { %v956_v54 = vmul.f32 0.6931472, %v1447_v51 }
 0x34c   : > { %v926_v56 = vpop.xlane.xlu0 %925 }
 0x34d   : > { %v944_v55 = vpop.xlane.xlu1 %943  ;;  %v986_v57 = vsub.f32 %v1773_v47, %v956_v54 }
 0x34e   : > { %1456 = vlog2.f32 %v944_v55  ;;  %v1449_v60 = vpop.eup %1448 }
 0x34f   : > { %1458 = vlog2.f32 %v926_v56  ;;  %v1451_v61 = vpop.eup %1450  ;;  %1002 = vst [vmem:[%s1651_s7 + $0x8] sm:$0xff] %v986_v57  ;;  %v972_v62 = vmul.f32 0.6931472, %v1449_v60 }
 0x350   : > { %v954_v3 = vmul.f32 0.6931472, %v1451_v61 }
 0x351   : > { %v932_v0 = vpop.xlane.xlu1 %931  ;;  %v942_v2 = vpop.xlane.xlu0 %941  ;;  %v994_v4 = vsub.f32 %v1771_v46, %v972_v62 }
 0x352   : > { %1460 = vlog2.f32 %v932_v0  ;;  %v1453_v5 = vpop.eup %1452  ;;  %v985_v7 = vsub.f32 %v1779_v53, %v954_v3 }
 0x353   : > { %1462 = vlog2.f32 %v942_v2  ;;  %v1455_v9 = vpop.eup %1454  ;;  %1010 = vst [vmem:[%s1651_s7 + $0x48] sm:$0xff] %v994_v4  ;;  %v960_v47 = vmul.f32 0.6931472, %v1453_v5 }
 0x354   : > { %1001 = vst [vmem:[%s1651_s7] sm:$0xff] %v985_v7  ;;  %v970_v12 = vmul.f32 0.6931472, %v1455_v9 }
 0x355   : > { %v948_v10 = vpop.xlane.xlu1 %947  ;;  %v930_v11 = vpop.xlane.xlu0 %929  ;;  %v988_v13 = vsub.f32 %v1777_v52, %v960_v47 }
 0x356   : > { %1464 = vlog2.f32 %v948_v10  ;;  %v993_v46 = vsub.f32 %v1783_v58, %v970_v12 }
 0x357   : > { %1466 = vlog2.f32 %v930_v11  ;;  %1004 = vst [vmem:[%s1651_s7 + $0x18] sm:$0xff] %v988_v13 }
 0x358   : > { %v1457_v15 = vpop.eup %1456  ;;  %1009 = vst [vmem:[%s1651_s7 + $0x40] sm:$0xff] %v993_v46 }
 0x359   : > { %v1459_v17 = vpop.eup %1458  ;;  %v976_v53 = vmul.f32 0.6931472, %v1457_v15  ;;  %v936_v18 = vpop.xlane.xlu1 %935 }
 0x35a   : > { %v946_v19 = vpop.xlane.xlu0 %945  ;;  %v958_v20 = vmul.f32 0.6931472, %v1459_v17  ;;  %1468 = vlog2.f32 %v936_v18 }
 0x35b   : > { %v996_v21 = vsub.f32 %v1785_v59, %v976_v53  ;;  %1470 = vlog2.f32 %v946_v19 }
 0x35c   : > { %v1461_v23 = vpop.eup %1460  ;;  %v987_v52 = vsub.f32 %v1788_v63, %v958_v20 }
 0x35d   : > { %v1463_v25 = vpop.eup %1462  ;;  %1012 = vst [vmem:[%s1651_s7 + $0x58] sm:$0xff] %v996_v21  ;;  %v964_v58 = vmul.f32 0.6931472, %v1461_v23  ;;  %v952_v26 = vpop.xlane.xlu1 %951 }
 0x35e   : > { %v934_v27 = vpop.xlane.xlu0 %933  ;;  %1003 = vst [vmem:[%s1651_s7 + $0x10] sm:$0xff] %v987_v52  ;;  %v974_v28 = vmul.f32 0.6931472, %v1463_v25  ;;  %1472 = vlog2.f32 %v952_v26 }
 0x35f   : > { %v990_v29 = vsub.f32 %v1794_v6, %v964_v58  ;;  %1474 = vlog2.f32 %v934_v27 }
 0x360   : > { %v1465_v59 = vpop.eup %1464  ;;  %v995_v31 = vsub.f32 %v1791_v1, %v974_v28 }
 0x361   : > { %v1467_v33 = vpop.eup %1466  ;;  %1006 = vst [vmem:[%s1651_s7 + $0x28] sm:$0xff] %v990_v29  ;;  %v980_v63 = vmul.f32 0.6931472, %v1465_v59 }
 0x362   : > { %v950_v34 = vpop.xlane.xlu0 %949  ;;  %1011 = vst [vmem:[%s1651_s7 + $0x50] sm:$0xff] %v995_v31  ;;  %v962_v35 = vmul.f32 0.6931472, %v1467_v33 }
 0x363   : > { %1476 = vlog2.f32 %v950_v34  ;;  %v998_v36 = vsub.f32 %v1800_v14, %v980_v63 }
 0x364   : > { %v1469_v37 = vpop.eup %1468  ;;  %v989_v38 = vsub.f32 %v1797_v8, %v962_v35 }
 0x365   : > { %v1471_v6 = vpop.eup %1470  ;;  %1014 = vst [vmem:[%s1651_s7 + $0x68] sm:$0xff] %v998_v36  ;;  %v968_v39 = vmul.f32 0.6931472, %v1469_v37 }
 0x366   : > { %1005 = vst [vmem:[%s1651_s7 + $0x20] sm:$0xff] %v989_v38  ;;  %v978_v1 = vmul.f32 0.6931472, %v1471_v6 }
 0x367   : > { %v992_v40 = vsub.f32 %v1807_v22, %v968_v39 }
 0x368   : > { %v1473_v41 = vpop.eup %1472  ;;  %v997_v42 = vsub.f32 %v1803_v16, %v978_v1 }
 0x369   : > { %v1475_v43 = vpop.eup %1474  ;;  %1008 = vst [vmem:[%s1651_s7 + $0x38] sm:$0xff] %v992_v40  ;;  %v984_v44 = vmul.f32 0.6931472, %v1473_v41 }
 0x36a   : > { %1013 = vst [vmem:[%s1651_s7 + $0x60] sm:$0xff] %v997_v42  ;;  %v966_v14 = vmul.f32 0.6931472, %v1475_v43 }
 0x36b   : > { %v1000_v8 = vsub.f32 %v1815_v30, %v984_v44 }
 0x36c   : > { %v991_v48 = vsub.f32 %v1811_v24, %v966_v14 }
 0x36d   : > { %v1477_v45 = vpop.eup %1476  ;;  %1016 = vst [vmem:[%s1651_s7 + $0x78] sm:$0xff] %v1000_v8 }
 0x36e   : > { %v982_v49 = vmul.f32 0.6931472, %v1477_v45  ;;  %1007 = vst [vmem:[%s1651_s7 + $0x30] sm:$0xff] %v991_v48 }
 0x370   : > { %v999_v50 = vsub.f32 %v1819_v32, %v982_v49 }
 0x372   : > { %1015 = vst [vmem:[%s1651_s7 + $0x70] sm:$0xff] %v999_v50 }
 0x373 PF: > { %s14_s21 = sadd.s32 1, %s1532_s21   ;;  %s1881_s15 = smov %s1512_s16 }
 0x374   : > { %p11_p0 = scmp.ge.s32.totalorder %s14_s21, 6   ;;  %s1882_s16 = smov %s1611_s28 }
 0x375   : > { %s1883_s17 = smov %s1524_s19  ;;  %s1884_s18 = smov %s1528_s20 }
 0x376   : > { %s1885_s19 = smov %s1888_s22  ;;  %s1886_s20 = smov %s1892_s23 }
 0x377   :  { %13 = sbr.rel (!%p11_p0) target bundleno = 4 (0x4), region = 123 }

// kernel: gcn_forward.2
= control target key start
LH: loop header
LB: loop body
LE: loop exit
PB: predicated region body
PF: predicated region fallthrough
CT: control target
= control target key end

     0   :  { %s1259_s15 = smov 0   ;;  %s1261_s16 = smov 0   ;;  %s1488_s0 = inlined_call_operand.vmem [shape: bf16[256,256], index: 0, kind: input, shape index: {}]   ;;  %s1489_s1 = inlined_call_operand.vmem [shape: bf16[256,160], index: 1, kind: input, shape index: {}]   ;;  %s1490_s2 = inlined_call_operand.vmem [shape: f32[160,128], index: 2, kind: input, shape index: {}]   ;;  %s1491_s3 = inlined_call_operand.vmem [shape: f32[1,128], index: 3, kind: input, shape index: {}]   ;;  %s1492_s4 = inlined_call_operand.vmem [shape: f32[256,128], index: 4, kind: output, shape index: {}]  }
   0x1   :  { %s1263_s17 = smov 0   ;;  %s1265_s18 = smov 0  }
   0x2   :  { %s1267_s19 = smov 0   ;;  %s1269_s20 = smov 0  }
   0x3   :  { %s1271_s21 = smov 0  }
   0x4 LB: > { %s23_s22 = sadd.s32 1, %s1222_s19  ;;  %s26_s23 = sadd.s32 1, %s1226_s20  ;;  %s1230_s21 = sphi %s1271_s21, %s14_s21   ;;  %s1226_s20 = sphi %s1269_s20, %s1498_s20   ;;  %s1222_s19 = sphi %s1267_s19, %s1497_s19   ;;  %s1218_s18 = sphi %s1265_s18, %s1496_s18   ;;  %s1214_s17 = sphi %s1263_s17, %s1495_s17   ;;  %s1210_s16 = sphi %s1261_s16, %s1494_s16   ;;  %s1206_s15 = sphi %s1259_s15, %s1493_s15  }
   0x5   : > { %p24_p0 = scmp.ge.s32.totalorder %s23_s22, 2  ;;  %p42_p1 = scmp.ne.s32.totalorder %s1210_s16, %s1206_s15 }
   0x6   : > { %p43_p2 = scmp.eq.s32.totalorder %s1230_s21, 0  ;;  %s35_s27 = sadd.s32 1, %s1210_s16 }
   0x7   : > { %s1500_s22 = smov (%p24_p0, %s23_s22), 0  ;;  %s1502_s23 = smov (!%p24_p0, %s26_s23), %s1226_s20 }
   0x8   : > { %p44_p3 = por %p43_p2, %p42_p1  ;;  %p28_p4 = scmp.ge.s32.totalorder %s1502_s23, 2 }
   0x9   : > { %s31_s24 = ssub.s32 %s1222_s19, %s1500_s22  ;;  %p987_p6 = scmp.ge.s32.totalorder %s1230_s21, 4 }
   0xa   : > { %s1504_s23 = smov (%p28_p4, %s1502_s23), 0 }
   0xb   : > { %s30_s25 = ssub.s32 %s1226_s20, %s1504_s23  ;;  %168 = sbr.rel (%p987_p6) target bundleno = 34 (0x22), region = 24 }
   0xc   : > { %s32_s26 = sor.u32 %s31_s24, %s30_s25 }
   0xd   : > { %p33_p5 = scmp.eq.s32.totalorder %s32_s26, 0 }
   0xf   : > { %s1310_s28 = scalar_select %p33_p5, %s1210_s16, %s35_s27  }
  0x12   : > { %171 = sbr.rel (!%p44_p3) target bundleno = 34 (0x22), region = 28  ;;  %s173_s29 = sand.u32 (%p44_p3), 1, %s1210_s16  }
  0x13   : > { %s1036_s30 = sshll.u32 (%p44_p3), %s1226_s20, 5  ;;  %s988_s5 = sshll.u32 (%p44_p3), %s173_s29, 6 }
  0x14   : > { %s178_s6 = sadd.s32 (%p44_p3), %s1222_s19, %s1036_s30  ;;  %s175_s11 = scalar_lea.vmem (%p44_p3), [#allocation3], %s988_s5 }
  0x15   : > { %s991_s7 = sshll.u32 (%p44_p3), %s178_s6, 2 }
  0x16   : > { %s1319_s10 = scalar_lea.vmem (%p44_p3), %s1488_s0, %s991_s7 }
  0x17   : > { %v196_v0 = vld [vmem:[%s1319_s10] sm:$0xf] (%p44_p3)  ;;  %v198_v1 = vld [vmem:[%s1319_s10 + $0x8] sm:$0xf] (%p44_p3)  ;;  %v200_v2 = vld [vmem:[%s1319_s10 + $0x10] sm:$0xf] (%p44_p3) }
  0x18   : > { %197 = vst [vmem:[%s175_s11] sm:$0xf] (%p44_p3), %v196_v0  ;;  %199 = vst [vmem:[%s175_s11 + $0x4] sm:$0xf] (%p44_p3), %v198_v1  ;;  %v202_v3 = vld [vmem:[%s1319_s10 + $0x18] sm:$0xf] (%p44_p3) }
  0x19   : > { %201 = vst [vmem:[%s175_s11 + $0x8] sm:$0xf] %v200_v2  ;;  %v204_v4 = vld [vmem:[%s1319_s10 + $0x20] sm:$0xf]  ;;  %v206_v5 = vld [vmem:[%s1319_s10 + $0x28] sm:$0xf] }
  0x1a   : > { %203 = vst [vmem:[%s175_s11 + $0xc] sm:$0xf] %v202_v3  ;;  %205 = vst [vmem:[%s175_s11 + $0x10] sm:$0xf] %v204_v4  ;;  %v208_v6 = vld [vmem:[%s1319_s10 + $0x30] sm:$0xf] }
  0x1b   : > { %207 = vst [vmem:[%s175_s11 + $0x14] sm:$0xf] %v206_v5  ;;  %v210_v7 = vld [vmem:[%s1319_s10 + $0x38] sm:$0xf]  ;;  %v212_v8 = vld [vmem:[%s1319_s10 + $0x40] sm:$0xf] }
  0x1c   : > { %209 = vst [vmem:[%s175_s11 + $0x18] sm:$0xf] %v208_v6  ;;  %211 = vst [vmem:[%s175_s11 + $0x1c] sm:$0xf] %v210_v7  ;;  %v214_v9 = vld [vmem:[%s1319_s10 + $0x48] sm:$0xf] }
  0x1d   : > { %213 = vst [vmem:[%s175_s11 + $0x20] sm:$0xf] %v212_v8  ;;  %v216_v10 = vld [vmem:[%s1319_s10 + $0x50] sm:$0xf]  ;;  %v218_v11 = vld [vmem:[%s1319_s10 + $0x58] sm:$0xf] }
  0x1e   : > { %215 = vst [vmem:[%s175_s11 + $0x24] sm:$0xf] %v214_v9  ;;  %217 = vst [vmem:[%s175_s11 + $0x28] sm:$0xf] %v216_v10  ;;  %v220_v12 = vld [vmem:[%s1319_s10 + $0x60] sm:$0xf] }
  0x1f   : > { %219 = vst [vmem:[%s175_s11 + $0x2c] sm:$0xf] %v218_v11  ;;  %v222_v13 = vld [vmem:[%s1319_s10 + $0x68] sm:$0xf]  ;;  %v224_v14 = vld [vmem:[%s1319_s10 + $0x70] sm:$0xf] }
  0x20   : > { %221 = vst [vmem:[%s175_s11 + $0x30] sm:$0xf] %v220_v12  ;;  %223 = vst [vmem:[%s175_s11 + $0x34] sm:$0xf] %v222_v13  ;;  %v226_v15 = vld [vmem:[%s1319_s10 + $0x78] sm:$0xf] }
  0x21   : > { %225 = vst [vmem:[%s175_s11 + $0x38] sm:$0xf] %v224_v14  ;;  %227 = vst [vmem:[%s175_s11 + $0x3c] sm:$0xf] %v226_v15 }
  0x22 PF: > { %p992_p7 = scmp.ge.s32.totalorder %s1230_s21, 1  ;;  %p291_p8 = scmp.lt.s32.totalorder %s1230_s21, 5 }
  0x24   : > { %p292_p9 = pnand %p992_p7, %p291_p8 }
  0x25   : > { %s298_s12 = sand.u32 (!%p292_p9), 1, %s1206_s15   ;;  %s994_s13 = sshll.u32 (!%p292_p9), %s1214_s17, 4 }
  0x26   : > { %295 = sbr.rel (%p292_p9) target bundleno = 627 (0x273), region = 73  ;;  %s993_s14 = sshll.u32 (!%p292_p9), %s298_s12, 6 }
  0x27   : > { %p331_p10 = scmp.lt.s32.totalorder (!%p292_p9), %s994_s13, 31  ;;  %s997_s24 = sshll.u32 (!%p292_p9), %s1218_s18, 4 }
  0x28   : > { %p338_p11 = scmp.lt.s32.totalorder (!%p292_p9), %s997_s24, 31  ;;  %s1352_s15 = scalar_lea.vmem (!%p292_p9), [#allocation3], %s993_s14 }
  0x29   : > { %p999_p12 = scmp.ne.s32.totalorder (!%p292_p9), %s1214_s17, 0 }
  0x2d   : > { %s1506_s13 = smov (!%p331_p10, %s994_s13), 31  ;;  %s1508_s24 = smov (!%p338_p11, %s997_s24), 31 }
  0x2e   : > { %s1037_s25 = sshll.u32 %s1506_s13, 3  ;;  %s998_s30 = sshll.u32 %s1508_s24, 3  ;;  %v1232_v16 = vmov (!%p999_p12), 0.0  }
  0x2f   : > { %s1345_s29 = scalar_lea.vmem %s1489_s1, %s1037_s25  ;;  %s1350_s7 = scalar_lea.vmem %s1492_s4, %s998_s30  ;;  %348 = vst [vmem:[#allocation2] sm:$0xff] (!%p999_p12), %v1232_v16  ;;  %349 = vst [vmem:[#allocation2 + $0x8] sm:$0xff] (!%p999_p12), %v1232_v16 }
  0x30   : > { %347 = sbr.rel (%p999_p12) target bundleno = 55 (0x37), region = 81  ;;  %350 = vst [vmem:[#allocation2 + $0x10] sm:$0xff] (!%p999_p12), %v1232_v16  ;;  %351 = vst [vmem:[#allocation2 + $0x18] sm:$0xff] (!%p999_p12), %v1232_v16 }
  0x31   : > { %352 = vst [vmem:[#allocation2 + $0x20] sm:$0xff] (!%p999_p12), %v1232_v16  ;;  %353 = vst [vmem:[#allocation2 + $0x28] sm:$0xff] (!%p999_p12), %v1232_v16 }
  0x32   : > { %354 = vst [vmem:[#allocation2 + $0x30] sm:$0xff] (!%p999_p12), %v1232_v16  ;;  %355 = vst [vmem:[#allocation2 + $0x38] sm:$0xff] (!%p999_p12), %v1232_v16 }
  0x33   : > { %356 = vst [vmem:[#allocation2 + $0x40] sm:$0xff] (!%p999_p12), %v1232_v16  ;;  %357 = vst [vmem:[#allocation2 + $0x48] sm:$0xff] (!%p999_p12), %v1232_v16 }
  0x34   : > { %358 = vst [vmem:[#allocation2 + $0x50] sm:$0xff] (!%p999_p12), %v1232_v16  ;;  %359 = vst [vmem:[#allocation2 + $0x58] sm:$0xff] (!%p999_p12), %v1232_v16 }
  0x35   : > { %360 = vst [vmem:[#allocation2 + $0x60] sm:$0xff] (!%p999_p12), %v1232_v16  ;;  %361 = vst [vmem:[#allocation2 + $0x68] sm:$0xff] (!%p999_p12), %v1232_v16 }
  0x36   : > { %362 = vst [vmem:[#allocation2 + $0x70] sm:$0xff] (!%p999_p12), %v1232_v16  ;;  %363 = vst [vmem:[#allocation2 + $0x78] sm:$0xff] (!%p999_p12), %v1232_v16 }
  0x37 PF: > { %v380_v17 = vld [vmem:[%s1490_s2] sm:$0xff]  ;;  %v381_v18 = vld [vmem:[%s1490_s2 + $0x8] sm:$0xff]  ;;  %v382_v19 = vld [vmem:[%s1490_s2 + $0x10] sm:$0xff]  ;;  %v1233_v20 = vmov 0   ;;  %vm482_vm0 = vcmask 261120   ;;  %p1032_p13 = scmp.ne.s32.totalorder %s1214_s17, 1 }
  0x38   : > { %507 = vmatprep.subr.bf16.mxu0 %v1233_v20  ;;  %v400_v21 = vpack.c.bf16 %v381_v18, %v380_v17  ;;  %v383_v22 = vld [vmem:[%s1490_s2 + $0x18] sm:$0xff]  ;;  %v384_v24 = vld [vmem:[%s1490_s2 + $0x20] sm:$0xff]  ;;  %v385_v25 = vld [vmem:[%s1490_s2 + $0x28] sm:$0xff] }
  0x39   : > { %v401_v23 = vpack.c.bf16 %v383_v22, %v382_v19  ;;  %v402_v26 = vpack.c.bf16 %v385_v25, %v384_v24  ;;  %v386_v27 = vld [vmem:[%s1490_s2 + $0x30] sm:$0xff]  ;;  %v1146_v28 = vld [vmem:[%s1345_s29 + $0x4] ss:$8 sps:$4 sm:$0xff]   ;;  %v387_v29 = vld [vmem:[%s1490_s2 + $0x38] sm:$0xff] }
  0x3a   : > { %508 = vmatpush1.bf16.msra.mxu0 %v400_v21  ;;  %1016 = vmatprep.mubr.msk.bf16.mxu0 %vm482_vm0, %v1146_v28  ;;  %v403_v30 = vpack.c.bf16 %v387_v29, %v386_v27  ;;  %v388_v31 = vld [vmem:[%s1490_s2 + $0x40] sm:$0xff]  ;;  %v389_v32 = vld [vmem:[%s1490_s2 + $0x48] sm:$0xff]  ;;  %v390_v34 = vld [vmem:[%s1490_s2 + $0x50] sm:$0xff] }
  0x3b   : > { %509 = vmatprep.subr.bf16.mxu0 %v1233_v20  ;;  %v404_v33 = vpack.c.bf16 %v389_v32, %v388_v31  ;;  %v391_v35 = vld [vmem:[%s1490_s2 + $0x58] sm:$0xff]  ;;  %v392_v36 = vld [vmem:[%s1490_s2 + $0x60] sm:$0xff]  ;;  %v393_v37 = vld [vmem:[%s1490_s2 + $0x68] sm:$0xff] }
  0x3c   : > { %v405_v38 = vpack.c.bf16 %v391_v35, %v390_v34  ;;  %v406_v39 = vpack.c.bf16 %v393_v37, %v392_v36  ;;  %v394_v40 = vld [vmem:[%s1490_s2 + $0x70] sm:$0xff]  ;;  %v395_v41 = vld [vmem:[%s1490_s2 + $0x78] sm:$0xff]  ;;  %v396_v43 = vld [vmem:[%s1490_s2 + $0x80] sm:$0xff] }
  0x3d   : > { %v407_v42 = vpack.c.bf16 %v395_v41, %v394_v40  ;;  %v397_v44 = vld [vmem:[%s1490_s2 + $0x88] sm:$0xff]  ;;  %v398_v46 = vld [vmem:[%s1490_s2 + $0x90] sm:$0xff]  ;;  %v399_v47 = vld [vmem:[%s1490_s2 + $0x98] sm:$0xff] }
  0x3e   : > { %510 = vmatpush1.bf16.msra.mxu0 %v401_v23  ;;  %v408_v45 = vpack.c.bf16 %v397_v44, %v396_v43  ;;  %v409_v48 = vpack.c.bf16 %v399_v47, %v398_v46  ;;  %v1144_v49 = vld [vmem:[%s1345_s29] ss:$8 sps:$4 sm:$0xff]   ;;  %v1147_v50 = vld [vmem:[%s1345_s29 + $0x14] ss:$8 sps:$4 sm:$0xff]   ;;  %v1149_v51 = vld [vmem:[%s1345_s29 + $0x10] ss:$8 sps:$4 sm:$0xff]  }
  0x3f   : > { %511 = vmatprep.subr.bf16.mxu0 %v1233_v20  ;;  %v1150_v52 = vld [vmem:[%s1345_s29 + $0x24] ss:$8 sps:$4 sm:$0xff]   ;;  %v1152_v53 = vld [vmem:[%s1345_s29 + $0x20] ss:$8 sps:$4 sm:$0xff]   ;;  %v1153_v54 = vld [vmem:[%s1345_s29 + $0x34] ss:$8 sps:$4 sm:$0xff]  }
  0x40   : > { %v1155_v55 = vld [vmem:[%s1345_s29 + $0x30] ss:$8 sps:$4 sm:$0xff]   ;;  %v1156_v56 = vld [vmem:[%s1345_s29 + $0x44] ss:$8 sps:$4 sm:$0xff]   ;;  %v1158_v57 = vld [vmem:[%s1345_s29 + $0x40] ss:$8 sps:$4 sm:$0xff]  }
  0x41   : > { %v1159_v58 = vld [vmem:[%s1345_s29 + $0x54] ss:$8 sps:$4 sm:$0xff]   ;;  %v1161_v59 = vld [vmem:[%s1345_s29 + $0x50] ss:$8 sps:$4 sm:$0xff]   ;;  %v1162_v60 = vld [vmem:[%s1345_s29 + $0x64] ss:$8 sps:$4 sm:$0xff]  }
  0x42   : > { %512 = vmatpush1.bf16.msra.mxu0 %v402_v26  ;;  %v1164_v61 = vld [vmem:[%s1345_s29 + $0x60] ss:$8 sps:$4 sm:$0xff]   ;;  %v1165_v62 = vld [vmem:[%s1345_s29 + $0x74] ss:$8 sps:$4 sm:$0xff]   ;;  %v1167_v63 = vld [vmem:[%s1345_s29 + $0x70] ss:$8 sps:$4 sm:$0xff]  }
  0x43   : > { %513 = vmatprep.subr.bf16.mxu0 %v1233_v20  ;;  %v1168_v0 = vld [vmem:[%s1352_s15] sm:$0xff]   ;;  %v1169_v41 = vld [vmem:[%s1352_s15 + $0x8] sm:$0xff]   ;;  %v1171_v43 = vld [vmem:[%s1352_s15 + $0x18] sm:$0xff]  }
  0x44   : > { %1070 = vmatprep.mubr.bf16.mxu1 %v1168_v0  ;;  %v1172_v44 = vld [vmem:[%s1352_s15 + $0x20] sm:$0xff]   ;;  %v1174_v46 = vld [vmem:[%s1352_s15 + $0x30] sm:$0xff]   ;;  %v1175_v47 = vld [vmem:[%s1352_s15 + $0x38] sm:$0xff]  }
  0x46   : > { %514 = vmatpush1.bf16.msra.mxu0 %v403_v30 }
  0x47   : > { %515 = vmatprep.subr.bf16.mxu0 %v1233_v20 }
  0x4a   : > { %516 = vmatpush1.bf16.msra.mxu0 %v404_v33 }
  0x4b   : > { %517 = vmatprep.subr.bf16.mxu0 %v1233_v20 }
  0x4e   : > { %518 = vmatpush1.bf16.msra.mxu0 %v405_v38 }
  0x4f   : > { %519 = vmatprep.subr.bf16.mxu0 %v1233_v20 }
  0x52   : > { %520 = vmatpush1.bf16.msra.mxu0 %v406_v39 }
  0x53   : > { %521 = vmatprep.subr.bf16.mxu0 %v1233_v20 }
  0x56   : > { %522 = vmatpush1.bf16.msra.mxu0 %v407_v42  ;;  %v1170_v42 = vld [vmem:[%s1352_s15 + $0x10] sm:$0xff]  }
  0x57   : > { %523 = vmatprep.subr.bf16.mxu0 %v1233_v20 }
  0x5a   : > { %524 = vmatpush1.bf16.msra.mxu0 %v408_v45  ;;  %v1173_v45 = vld [vmem:[%s1352_s15 + $0x28] sm:$0xff]  }
  0x5b   : > { %525 = vmatprep.subr.bf16.mxu0 %v1233_v20 }
  0x5e   : > { %526 = vmatpush1.bf16.msra.mxu0 %v409_v48  ;;  %v606_v48 = vld [vmem:[#allocation2 + $0x10] sm:$0xff] }
  0x61   : > { %540 = vmatmul.mubr.bf16.vlgmr.msra.gmra.mrb[0].mxu0 %v1144_v49  ;;  %v604_v49 = vld [vmem:[#allocation2] sm:$0xff] }
  0x62   : > { %1017 = vmatprep.mubr.msk.bf16.mxu0 %vm482_vm0, %v1147_v50 }
  0x69   : > { %548 = vmatmul.mubr.bf16.gmra.mrb[4].mxu0 %v1149_v51  ;;  %v607_v51 = vld [vmem:[#allocation2 + $0x18] sm:$0xff] }
  0x6a   : > { %1018 = vmatprep.mubr.msk.bf16.mxu0 %vm482_vm0, %v1150_v52 }
  0x71   : > { %556 = vmatmul.mubr.bf16.gmra.mrb[8].mxu0 %v1152_v53 }
  0x72   : > { %1019 = vmatprep.mubr.msk.bf16.mxu0 %vm482_vm0, %v1153_v54  ;;  %v605_v54 = vld [vmem:[#allocation2 + $0x8] sm:$0xff] }
  0x79   : > { %564 = vmatmul.mubr.bf16.gmra.mrb[12].mxu0 %v1155_v55 }
  0x7a   : > { %1020 = vmatprep.mubr.msk.bf16.mxu0 %vm482_vm0, %v1156_v56 }
  0x81   : > { %572 = vmatmul.mubr.bf16.gmra.mrb[16].mxu0 %v1158_v57 }
  0x82   : > { %1021 = vmatprep.mubr.msk.bf16.mxu0 %vm482_vm0, %v1159_v58 }
  0x89   : > { %580 = vmatmul.mubr.bf16.gmra.mrb[20].mxu0 %v1161_v59 }
  0x8a   : > { %1022 = vmatprep.mubr.msk.bf16.mxu0 %vm482_vm0, %v1162_v60  ;;  %v610_v60 = vld [vmem:[#allocation2 + $0x30] sm:$0xff] }
  0x91   : > { %588 = vmatmul.mubr.bf16.gmra.mrb[24].mxu0 %v1164_v61  ;;  %v608_v61 = vld [vmem:[#allocation2 + $0x20] sm:$0xff] }
  0x92   : > { %1023 = vmatprep.mubr.msk.bf16.mxu0 %vm482_vm0, %v1165_v62 }
  0x99   : > { %596 = vmatmul.mubr.bf16.gmra.mrb[28].mxu0 %v1167_v63  ;;  %v611_v63 = vld [vmem:[#allocation2 + $0x38] sm:$0xff] }
 0x134   : > { %v541_v1 = vpop.f32.mrb[0].mxu0 }
 0x135   : > { %v543_v2 = vpop.f32.mrb[1].mxu0 }
 0x136   : > { %v544_v3 = vpop.f32.mrb[2].mxu0  ;;  %v609_v2 = vld [vmem:[#allocation2 + $0x28] sm:$0xff] }
 0x137   : > { %v636_v4 = vpack.c.bf16 %v544_v3, %v541_v1  ;;  %v546_v5 = vpop.f32.mrb[3].mxu0 }
 0x139   : > { %1054 = vmatprep.subr.bf16.mxu1 %v636_v4 }
 0x13a   : > { %1055 = vmatpush3.bf16.msra.mxu1 %v636_v4 }
 0x13c   : > { %v549_v6 = vpop.f32.mrb[4].mxu0 }
 0x13d   : > { %v551_v7 = vpop.f32.mrb[5].mxu0 }
 0x13e   : > { %v552_v8 = vpop.f32.mrb[6].mxu0 }
 0x13f   : > { %v637_v9 = vpack.c.bf16 %v552_v8, %v549_v6  ;;  %v554_v10 = vpop.f32.mrb[7].mxu0  ;;  %v614_v8 = vld [vmem:[#allocation2 + $0x50] sm:$0xff] }
 0x141   : > { %1056 = vmatprep.subr.bf16.mxu1 %v637_v9 }
 0x142   : > { %1057 = vmatpush3.bf16.msra.mxu1 %v637_v9  ;;  %v612_v9 = vld [vmem:[#allocation2 + $0x40] sm:$0xff] }
 0x144   : > { %v557_v11 = vpop.f32.mrb[8].mxu0 }
 0x145   : > { %v559_v12 = vpop.f32.mrb[9].mxu0 }
 0x146   : > { %v560_v13 = vpop.f32.mrb[10].mxu0 }
 0x147   : > { %v638_v14 = vpack.c.bf16 %v560_v13, %v557_v11  ;;  %v562_v15 = vpop.f32.mrb[11].mxu0  ;;  %v615_v11 = vld [vmem:[#allocation2 + $0x58] sm:$0xff] }
 0x149   : > { %1058 = vmatprep.subr.bf16.mxu1 %v638_v14 }
 0x14a   : > { %1059 = vmatpush3.bf16.msra.mxu1 %v638_v14  ;;  %v613_v14 = vld [vmem:[#allocation2 + $0x48] sm:$0xff] }
 0x14c   : > { %v565_v16 = vpop.f32.mrb[12].mxu0 }
 0x14d   : > { %v567_v17 = vpop.f32.mrb[13].mxu0 }
 0x14e   : > { %v568_v18 = vpop.f32.mrb[14].mxu0 }
 0x14f   : > { %v639_v19 = vpack.c.bf16 %v568_v18, %v565_v16  ;;  %v570_v20 = vpop.f32.mrb[15].mxu0 }
 0x150   : > { %v618_v20 = vld [vmem:[#allocation2 + $0x70] sm:$0xff] }
 0x151   : > { %1060 = vmatprep.subr.bf16.mxu1 %v639_v19 }
 0x152   : > { %1061 = vmatpush3.bf16.msra.mxu1 %v639_v19 }
 0x154   : > { %v573_v21 = vpop.f32.mrb[16].mxu0 }
 0x155   : > { %v575_v22 = vpop.f32.mrb[17].mxu0 }
 0x156   : > { %v576_v23 = vpop.f32.mrb[18].mxu0 }
 0x157   : > { %v640_v24 = vpack.c.bf16 %v576_v23, %v573_v21  ;;  %v578_v25 = vpop.f32.mrb[19].mxu0  ;;  %v616_v21 = vld [vmem:[#allocation2 + $0x60] sm:$0xff]  ;;  %v619_v23 = vld [vmem:[#allocation2 + $0x78] sm:$0xff] }
 0x159   : > { %1062 = vmatprep.subr.bf16.mxu1 %v640_v24 }
 0x15a   : > { %1063 = vmatpush3.bf16.msra.mxu1 %v640_v24 }
 0x15c   : > { %v581_v26 = vpop.f32.mrb[20].mxu0 }
 0x15d   : > { %v583_v27 = vpop.f32.mrb[21].mxu0 }
 0x15e   : > { %v584_v28 = vpop.f32.mrb[22].mxu0 }
 0x15f   : > { %v641_v29 = vpack.c.bf16 %v584_v28, %v581_v26  ;;  %v586_v30 = vpop.f32.mrb[23].mxu0  ;;  %v617_v26 = vld [vmem:[#allocation2 + $0x68] sm:$0xff] }
 0x161   : > { %1064 = vmatprep.subr.bf16.mxu1 %v641_v29 }
 0x162   : > { %1065 = vmatpush3.bf16.msra.mxu1 %v641_v29 }
 0x164   : > { %v589_v31 = vpop.f32.mrb[24].mxu0 }
 0x165   : > { %v591_v32 = vpop.f32.mrb[25].mxu0 }
 0x166   : > { %v592_v33 = vpop.f32.mrb[26].mxu0 }
 0x167   : > { %v642_v34 = vpack.c.bf16 %v592_v33, %v589_v31  ;;  %v594_v35 = vpop.f32.mrb[27].mxu0  ;;  %v1033_v33 = vld [vmem:[%s1491_s3] ss:$0 sm:$0xff] (!%p1032_p13) }
 0x169   : > { %1066 = vmatprep.subr.bf16.mxu1 %v642_v34 }
 0x16a   : > { %1067 = vmatpush3.bf16.msra.mxu1 %v642_v34 }
 0x16c   : > { %v597_v36 = vpop.f32.mrb[28].mxu0 }
 0x16d   : > { %v599_v37 = vpop.f32.mrb[29].mxu0 }
 0x16e   : > { %v600_v38 = vpop.f32.mrb[30].mxu0 }
 0x16f   : > { %v643_v39 = vpack.c.bf16 %v600_v38, %v597_v36  ;;  %v602_v40 = vpop.f32.mrb[31].mxu0 }
 0x171   : > { %1068 = vmatprep.subr.bf16.mxu1 %v643_v39 }
 0x172   : > { %1069 = vmatpush3.bf16.msra.mxu1 %v643_v39 }
 0x175   : > { %1071 = vmatmul.mubr.bf16.vlgmr.msra.gmra.mrb[0].mxu1 %v1169_v41 }
 0x176   : > { %1074 = vmatprep.mubr.bf16.mxu1 %v1170_v42 }
 0x17d   : > { %1075 = vmatmul.mubr.bf16.gmra.mrb[4].mxu1 %v1171_v43 }
 0x17e   : > { %1078 = vmatprep.mubr.bf16.mxu1 %v1172_v44 }
 0x185   : > { %1079 = vmatmul.mubr.bf16.gmra.mrb[8].mxu1 %v1173_v45 }
 0x186   : > { %1082 = vmatprep.mubr.bf16.mxu1 %v1174_v46 }
 0x18d   : > { %1083 = vmatmul.mubr.bf16.gmra.mrb[12].mxu1 %v1175_v47 }
 0x248   : > { %v1072_v50 = vpop.f32.mrb[0].mxu1 }
 0x249   : > { %v791_v52 = vadd.f32 %v1072_v50, %v606_v48  ;;  %v726_v53 = vpop.f32.mrb[1].mxu1 }
 0x24a   : > { %v789_v55 = vadd.f32 %v726_v53, %v604_v49  ;;  %v1073_v56 = vpop.f32.mrb[2].mxu1 }
 0x24b   : > { %807 = vst [vmem:[#allocation2 + $0x10] sm:$0xff] %v791_v52  ;;  %v792_v57 = vadd.f32 %v1073_v56, %v607_v51  ;;  %v729_v58 = vpop.f32.mrb[3].mxu1 }
 0x24c   : > { %805 = vst [vmem:[#allocation2] sm:$0xff] %v789_v55  ;;  %v790_v59 = vadd.f32 %v729_v58, %v605_v54 }
 0x24d   : > { %808 = vst [vmem:[#allocation2 + $0x18] sm:$0xff] %v792_v57 }
 0x24e   : > { %806 = vst [vmem:[#allocation2 + $0x8] sm:$0xff] %v790_v59 }
 0x250   : > { %v1076_v62 = vpop.f32.mrb[4].mxu1 }
 0x251   : > { %v795_v0 = vadd.f32 %v1076_v62, %v610_v60  ;;  %v742_v1 = vpop.f32.mrb[5].mxu1 }
 0x252   : > { %v793_v3 = vadd.f32 %v742_v1, %v608_v61  ;;  %v1077_v4 = vpop.f32.mrb[6].mxu1  ;;  %v827_v37 = vld [vmem:[#allocation2 + $0x10] sm:$0xff] (!%p1032_p13) }
 0x253   : > { %811 = vst [vmem:[#allocation2 + $0x30] sm:$0xff] %v795_v0  ;;  %v796_v5 = vadd.f32 %v1077_v4, %v611_v63  ;;  %v745_v6 = vpop.f32.mrb[7].mxu1  ;;  %v825_v32 = vld [vmem:[#allocation2] sm:$0xff] (!%p1032_p13)  ;;  %v850_v40 = vadd.f32 (!%p1032_p13), %v1033_v33, %v827_v37 }
 0x254   : > { %809 = vst [vmem:[#allocation2 + $0x20] sm:$0xff] %v793_v3  ;;  %v794_v7 = vadd.f32 %v745_v6, %v609_v2  ;;  %v848_v35 = vadd.f32 (!%p1032_p13), %v1033_v33, %v825_v32  ;;  %v828_v38 = vld [vmem:[#allocation2 + $0x18] sm:$0xff] (!%p1032_p13) }
 0x255   : > { %812 = vst [vmem:[#allocation2 + $0x38] sm:$0xff] %v796_v5  ;;  %v826_v34 = vld [vmem:[#allocation2 + $0x8] sm:$0xff] (!%p1032_p13)  ;;  %v851_v41 = vadd.f32 (!%p1032_p13), %v1033_v33, %v828_v38  ;;  %v866_v53 = vmax.f32 (!%p1032_p13), %v850_v40, 0.0 }
 0x256   : > { %810 = vst [vmem:[#allocation2 + $0x28] sm:$0xff] %v794_v7  ;;  %v849_v36 = vadd.f32 (!%p1032_p13), %v1033_v33, %v826_v34  ;;  %v864_v46 = vmax.f32 (!%p1032_p13), %v848_v35, 0.0 }
 0x257   : > { %v867_v54 = vmax.f32 (!%p1032_p13), %v851_v41, 0.0  ;;  %882 = vst [vmem:[%s1350_s7 + $0x10] sm:$0xff] (!%p1032_p13), %v866_v53 }
 0x258   : > { %v1080_v10 = vpop.f32.mrb[8].mxu1  ;;  %v865_v47 = vmax.f32 (!%p1032_p13), %v849_v36, 0.0  ;;  %880 = vst [vmem:[%s1350_s7] sm:$0xff] (!%p1032_p13), %v864_v46 }
 0x259   : > { %v799_v12 = vadd.f32 %v1080_v10, %v614_v8  ;;  %v758_v13 = vpop.f32.mrb[9].mxu1  ;;  %883 = vst [vmem:[%s1350_s7 + $0x18] sm:$0xff] (!%p1032_p13), %v867_v54 }
 0x25a   : > { %v797_v15 = vadd.f32 %v758_v13, %v612_v9  ;;  %v1081_v16 = vpop.f32.mrb[10].mxu1  ;;  %v831_v44 = vld [vmem:[#allocation2 + $0x30] sm:$0xff] (!%p1032_p13)  ;;  %881 = vst [vmem:[%s1350_s7 + $0x8] sm:$0xff] (!%p1032_p13), %v865_v47 }
 0x25b   : > { %815 = vst [vmem:[#allocation2 + $0x50] sm:$0xff] %v799_v12  ;;  %v800_v17 = vadd.f32 %v1081_v16, %v615_v11  ;;  %v761_v18 = vpop.f32.mrb[11].mxu1  ;;  %v829_v39 = vld [vmem:[#allocation2 + $0x20] sm:$0xff] (!%p1032_p13)  ;;  %v854_v49 = vadd.f32 (!%p1032_p13), %v1033_v33, %v831_v44 }
 0x25c   : > { %813 = vst [vmem:[#allocation2 + $0x40] sm:$0xff] %v797_v15  ;;  %v798_v19 = vadd.f32 %v761_v18, %v613_v14  ;;  %v852_v42 = vadd.f32 (!%p1032_p13), %v1033_v33, %v829_v39  ;;  %v832_v45 = vld [vmem:[#allocation2 + $0x38] sm:$0xff] (!%p1032_p13) }
 0x25d   : > { %816 = vst [vmem:[#allocation2 + $0x58] sm:$0xff] %v800_v17  ;;  %v830_v43 = vld [vmem:[#allocation2 + $0x28] sm:$0xff] (!%p1032_p13)  ;;  %v855_v56 = vadd.f32 (!%p1032_p13), %v1033_v33, %v832_v45  ;;  %v870_v61 = vmax.f32 (!%p1032_p13), %v854_v49, 0.0 }
 0x25e   : > { %814 = vst [vmem:[#allocation2 + $0x48] sm:$0xff] %v798_v19  ;;  %v853_v48 = vadd.f32 (!%p1032_p13), %v1033_v33, %v830_v43  ;;  %v868_v55 = vmax.f32 (!%p1032_p13), %v852_v42, 0.0 }
 0x25f   : > { %v871_v2 = vmax.f32 (!%p1032_p13), %v855_v56, 0.0  ;;  %886 = vst [vmem:[%s1350_s7 + $0x30] sm:$0xff] (!%p1032_p13), %v870_v61 }
 0x260   : > { %v1084_v22 = vpop.f32.mrb[12].mxu1  ;;  %824 = sbr.rel (%p1032_p13) target bundleno = 627 (0x273), region = 85  ;;  %v869_v60 = vmax.f32 (!%p1032_p13), %v853_v48, 0.0  ;;  %884 = vst [vmem:[%s1350_s7 + $0x20] sm:$0xff] (!%p1032_p13), %v868_v55 }
 0x261   : > { %v803_v24 = vadd.f32 %v1084_v22, %v618_v20  ;;  %v774_v25 = vpop.f32.mrb[13].mxu1  ;;  %887 = vst [vmem:[%s1350_s7 + $0x38] sm:$0xff] (!%p1032_p13), %v871_v2 }
 0x262   : > { %v801_v27 = vadd.f32 %v774_v25, %v616_v21  ;;  %v1085_v28 = vpop.f32.mrb[14].mxu1  ;;  %v835_v52 = vld [vmem:[#allocation2 + $0x50] sm:$0xff] (!%p1032_p13)  ;;  %885 = vst [vmem:[%s1350_s7 + $0x28] sm:$0xff] (!%p1032_p13), %v869_v60 }
 0x263   : > { %819 = vst [vmem:[#allocation2 + $0x70] sm:$0xff] %v803_v24  ;;  %v804_v29 = vadd.f32 %v1085_v28, %v619_v23  ;;  %v777_v30 = vpop.f32.mrb[15].mxu1  ;;  %v833_v50 = vld [vmem:[#allocation2 + $0x40] sm:$0xff] (!%p1032_p13)  ;;  %v858_v3 = vadd.f32 (!%p1032_p13), %v1033_v33, %v835_v52 }
 0x264   : > { %817 = vst [vmem:[#allocation2 + $0x60] sm:$0xff] %v801_v27  ;;  %v802_v31 = vadd.f32 %v777_v30, %v617_v26  ;;  %v836_v57 = vld [vmem:[#allocation2 + $0x58] sm:$0xff] (!%p1032_p13)  ;;  %v856_v62 = vadd.f32 (!%p1032_p13), %v1033_v33, %v833_v50 }
 0x265   : > { %820 = vst [vmem:[#allocation2 + $0x78] sm:$0xff] %v804_v29  ;;  %v834_v51 = vld [vmem:[#allocation2 + $0x48] sm:$0xff] (!%p1032_p13)  ;;  %v859_v4 = vadd.f32 (!%p1032_p13), %v1033_v33, %v836_v57  ;;  %v874_v10 = vmax.f32 (!%p1032_p13), %v858_v3, 0.0 }
 0x266   : > { %818 = vst [vmem:[#allocation2 + $0x68] sm:$0xff] %v802_v31  ;;  %v857_v63 = vadd.f32 (!%p1032_p13), %v1033_v33, %v834_v51  ;;  %v872_v6 = vmax.f32 (!%p1032_p13), %v856_v62, 0.0 }
 0x267   : > { %v875_v11 = vmax.f32 %v859_v4, 0.0  ;;  %890 = vst [vmem:[%s1350_s7 + $0x50] sm:$0xff] %v874_v10 }
 0x268   : > { %v873_v7 = vmax.f32 %v857_v63, 0.0  ;;  %888 = vst [vmem:[%s1350_s7 + $0x40] sm:$0xff] %v872_v6 }
 0x269   : > { %891 = vst [vmem:[%s1350_s7 + $0x58] sm:$0xff] %v875_v11 }
 0x26a   : > { %v839_v0 = vld [vmem:[#allocation2 + $0x70] sm:$0xff]  ;;  %889 = vst [vmem:[%s1350_s7 + $0x48] sm:$0xff] %v873_v7 }
 0x26b   : > { %v837_v58 = vld [vmem:[#allocation2 + $0x60] sm:$0xff]  ;;  %v862_v9 = vadd.f32 %v1033_v33, %v839_v0 }
 0x26c   : > { %v840_v1 = vld [vmem:[#allocation2 + $0x78] sm:$0xff]  ;;  %v860_v5 = vadd.f32 %v1033_v33, %v837_v58 }
 0x26d   : > { %v838_v59 = vld [vmem:[#allocation2 + $0x68] sm:$0xff]  ;;  %v863_v13 = vadd.f32 %v1033_v33, %v840_v1  ;;  %v878_v15 = vmax.f32 %v862_v9, 0.0 }
 0x26e   : > { %v861_v8 = vadd.f32 %v1033_v33, %v838_v59  ;;  %v876_v12 = vmax.f32 %v860_v5, 0.0 }
 0x26f   : > { %v879_v16 = vmax.f32 %v863_v13, 0.0  ;;  %894 = vst [vmem:[%s1350_s7 + $0x70] sm:$0xff] %v878_v15 }
 0x270   : > { %v877_v14 = vmax.f32 %v861_v8, 0.0  ;;  %892 = vst [vmem:[%s1350_s7 + $0x60] sm:$0xff] %v876_v12 }
 0x271   : > { %895 = vst [vmem:[%s1350_s7 + $0x78] sm:$0xff] %v879_v16 }
 0x272   : > { %893 = vst [vmem:[%s1350_s7 + $0x68] sm:$0xff] %v877_v14 }
 0x273 PF: > { %s14_s21 = sadd.s32 1, %s1230_s21   ;;  %s1493_s15 = smov %s1210_s16 }
 0x274   : > { %p11_p0 = scmp.ge.s32.totalorder %s14_s21, 6   ;;  %s1494_s16 = smov %s1310_s28 }
 0x275   : > { %s1495_s17 = smov %s1222_s19  ;;  %s1496_s18 = smov %s1226_s20 }
 0x276   : > { %s1497_s19 = smov %s1500_s22  ;;  %s1498_s20 = smov %s1504_s23 }
 0x277   :  { %13 = sbr.rel (!%p11_p0) target bundleno = 4 (0x4), region = 123 }

</bundles_post_ra>
